<compile_context>
chip_gen: v5e
topology: v5e:2x2
jax: 0.10.0
libtpu: 0.0.40
codegen_flags: <defaults>
</compile_context>

<pallas_src>
import jax
import jax.numpy as jnp
from jax.experimental import pallas as pl
from jax.experimental.pallas import tpu as pltpu  # noqa: F401

# ----- hyperparameters (module-level globals in the original code) -----
dimWE = 16          # word embedding dim
dimWPE = 4          # position embedding dim
dimC = 32           # conv channels == Encodered_dim
Encodered_dim = dimC
dimR = 8            # number of relations
MaxPos = 20
filter_size = 3
SenLen = (10, 12)   # (en, zh) sentence lengths
VOCAB_EN = 50
VOCAB_ZH = 60
# CNNDropout / Att_dropout: eval-mode forward -> identity (no-op)

D_EMB = dimWE + 2 * dimWPE   # 24 embedded features per encoder
C2 = 2 * dimC                # 64 = [share block | mono block] conv channels
LANE = 128                   # lane-dense output width


def _round_up(x, m):
    return ((x + m - 1) // m) * m


# ----------------------------------------------------------------------
# Single fused Pallas kernel: 4 CNN encoders + 3 RE heads
# ----------------------------------------------------------------------
def _mare_kernel(xcols_ref, w_ref, b_ref, tmask_ref,
                 rel_ref, mask_ref, rvec_ref, mw_ref, mb_ref, o_ref):
    # xcols_ref: (Lp*Tp, K*4D) im2col features (lane-dense)
    # w_ref    : (K*4D, 2C)    conv weights (share -> cols[0:C], mono -> cols[C:2C])
    # b_ref    : (Lp, 1, 2C)   per-row conv bias
    # tmask_ref: (Lp, Tp, 1)   valid conv positions per row
    # rel_ref  : (3, NRp, Lp, 2C) relation embeddings, channel-extended
    # mask_ref : (3, NumIn, Lp)   bag segment masks (global row coordinates)
    # rvec_ref : (3, NumIn, NRp, 2C) R_vec, channel-extended
    # mw_ref   : (3, 2C, 128), mb_ref: (3, 1, 128)  M layer, zero-padded lanes
    # o_ref    : (NumIn*NRp, 128) sum over heads of log_softmax(scores)
    Lp = b_ref.shape[0]
    Tp = tmask_ref.shape[1]
    C2k = w_ref.shape[1]
    H, NumIn, _ = mask_ref.shape
    NRp = rel_ref.shape[1]
    B, dRp = o_ref.shape
    neg = jnp.float32(-1e30)

    # ---- fused CNN encoders: one im2col MXU matmul + masked maxpool + tanh --
    conv = jnp.dot(xcols_ref[...], w_ref[...],
                   preferred_element_type=jnp.float32)            # (Lp*Tp, 2C)
    conv = conv.reshape(Lp, Tp, C2k) + b_ref[...]                 # tile-aligned split
    conv = jnp.where(tmask_ref[...] > 0.0, conv, neg)             # mask padded t
    enc = jnp.tanh(jnp.max(conv, axis=1))                         # (Lp, 2C)

    # ---- fused RE heads: masked segment softmax attention + scoring --------
    dmask = jax.lax.broadcasted_iota(jnp.int32, (B, dRp), 1) < dimR
    total = jnp.zeros((B, dRp), jnp.float32)
    for h in range(H):                                            # 3 heads, unrolled
        rel_h = rel_ref[h]                                        # (NRp, Lp, 2C)
        mask_h = mask_ref[h]                                      # (NumIn, Lp)

        # attention logits once per (relation, sentence); bags via broadcasting
        attn = jnp.sum(rel_h * enc[None, :, :], axis=-1)          # (NRp, Lp)
        logits = jnp.where(mask_h[:, None, :] > 0.0,
                           attn[None, :, :], neg)                 # (NumIn, NRp, Lp)
        mx = jnp.max(logits, axis=-1, keepdims=True)
        e = jnp.exp(logits - mx) * mask_h[:, None, :]
        den = jnp.sum(e, axis=-1, keepdims=True)
        att = e * pl.reciprocal(jnp.where(den > 0.0, den, 1.0), approx=True)

        att = att.reshape(B, Lp)                                  # NRp % 8 == 0 -> aligned
        S = jnp.dot(att, enc, preferred_element_type=jnp.float32)  # (B, 2C)
        rvec = rvec_ref[h].reshape(B, C2k)                        # (B, 2C)
        scores = (jnp.dot(S, mw_ref[h], preferred_element_type=jnp.float32)
                  + mb_ref[h]
                  + jnp.sum(rvec * S, axis=-1, keepdims=True))    # (B, 128)

        # log_softmax over the first dimR lanes only
        z = jnp.where(dmask, scores, neg)
        smax = jnp.max(z, axis=-1, keepdims=True)
        lse = jnp.log(jnp.sum(jnp.exp(z - smax), axis=-1, keepdims=True)) + smax
        total = total + (scores - lse)
    o_ref[...] = total


# ----------------------------------------------------------------------
# Wrapper: builds the fused operands and calls the kernel once (no grid)
# ----------------------------------------------------------------------
def _embed(p, words, pos1, pos2):
    return jnp.concatenate([p['word_emb'][words],
                            p['pos1_emb'][pos1],
                            p['pos2_emb'][pos2]], axis=2).astype(jnp.float32)


def _segments(l):
    l = l.astype(jnp.int32)
    starts = jnp.concatenate([jnp.zeros((1,), jnp.int32),
                              jnp.cumsum(l)[:-1].astype(jnp.int32)])
    return starts, starts + l


def _rvec(rel, starts, l):
    rv = jnp.transpose(rel[:, starts, :], (1, 0, 2))              # (NumIn, NumRe, E)
    return jnp.where((l > 0)[:, None, None], rv, 0.0)


def mare_forward(params, wordsEn, pos1En, pos2En, rEn, lEn,
                 wordsZh, pos1Zh, pos2Zh, rZh, lZh, re_mask):
    K = filter_size
    C = dimC
    E = Encodered_dim
    D = D_EMB

    # --- embedded inputs, feature layout [share | mono] per language --------
    x_se = _embed(params['share_en'], wordsEn, pos1En, pos2En)    # (Le, Se, D)
    x_me = _embed(params['mono_en'], wordsEn, pos1En, pos2En)
    x_sz = _embed(params['share_zh'], wordsZh, pos1Zh, pos2Zh)    # (Lz, Sz, D)
    x_mz = _embed(params['mono_zh'], wordsZh, pos1Zh, pos2Zh)

    Le, Se, _ = x_se.shape
    Lz, Sz, _ = x_sz.shape
    L = Le + Lz
    Lp = _round_up(L, 8)                        # sublane-aligned sentence rows
    Tp = _round_up(max(Se, Sz) - K + 1, 8)      # sublane-aligned conv positions
    Sp = Tp + K - 1

    x_en = jnp.concatenate([x_se, x_me], axis=-1)                 # (Le, Se, 2D)
    x_zh = jnp.concatenate([x_sz, x_mz], axis=-1)                 # (Lz, Sz, 2D)
    x_en = jnp.pad(x_en, ((0, 0), (0, Sp - Se), (0, 2 * D)))      # en feats at [0:2D]
    x_zh = jnp.pad(x_zh, ((0, 0), (0, Sp - Sz), (2 * D, 0)))      # zh feats at [2D:4D]
    x_all = jnp.pad(jnp.concatenate([x_en, x_zh], axis=0),
                    ((0, Lp - L), (0, 0), (0, 0)))                # (Lp, Sp, 4D)

    # im2col slab built here (fuses into the gather pipeline) -> lane-dense input
    xcols = jnp.concatenate([x_all[:, k:k + Tp, :] for k in range(K)], axis=-1)
    xcols = xcols.reshape(Lp * Tp, K * 4 * D)                     # (Lp*Tp, 288)

    # conv weights: share_* -> channels [0:C], mono_* -> channels [C:2C]
    w = jnp.zeros((K, 4 * D, C2), jnp.float32)
    w = w.at[:, 0 * D:1 * D, 0:C].set(params['share_en']['conv_w'])
    w = w.at[:, 1 * D:2 * D, C:2 * C].set(params['mono_en']['conv_w'])
    w = w.at[:, 2 * D:3 * D, 0:C].set(params['share_zh']['conv_w'])
    w = w.at[:, 3 * D:4 * D, C:2 * C].set(params['mono_zh']['conv_w'])
    w = w.reshape(K * 4 * D, C2)

    # per-row conv bias (en rows vs zh rows pick their language's biases)
    b_en = jnp.concatenate([params['share_en']['conv_b'],
                            params['mono_en']['conv_b']], axis=1)  # (1, 2C)
    b_zh = jnp.concatenate([params['share_zh']['conv_b'],
                            params['mono_zh']['conv_b']], axis=1)
    row = jnp.arange(Lp)
    b_rows = jnp.where((row < Le)[:, None], b_en, b_zh)[:, None, :]  # (Lp, 1, 2C)

    # valid conv positions per row; padding rows keep all-True so the maxpool
    # never reduces an all -1e30 row (their enc value is never attended anyway)
    t = jnp.arange(Tp)[None, :]
    tmask = jnp.where((row < Le)[:, None], t < Se - K + 1,
                      jnp.where((row < L)[:, None], t < Sz - K + 1, True))
    tmask = tmask.astype(jnp.float32)[:, :, None]                 # (Lp, Tp, 1)

    # --- RE-head operands ----------------------------------------------------
    NumRe = rEn.shape[0]
    NumIn = lEn.shape[0]
    NRp = _round_up(NumRe, 8)
    s_en, e_en = _segments(lEn)
    s_zh, e_zh = _segments(lZh)

    rel_en0 = params['enRE']['rel_emb'][rEn]                      # (NumRe, Le, E)
    rel_zh1 = params['zhRE']['rel_emb'][rZh]                      # (NumRe, Lz, E)
    rel_mu_en = params['multiRE']['rel_emb'][rEn]
    rel_mu_zh = params['multiRE']['rel_emb'][rZh]

    def _lay_rel(r_en, r_zh, blk):
        # place language rows at their global rows, features into channel block
        # `blk` (0 = share, 1 = mono); pad NumRe -> NRp
        full = jnp.zeros((NumRe, Lp, C2), jnp.float32)
        if r_en is not None:
            full = full.at[:, :Le, blk * E:(blk + 1) * E].set(r_en)
        if r_zh is not None:
            full = full.at[:, Le:L, blk * E:(blk + 1) * E].set(r_zh)
        return jnp.pad(full, ((0, NRp - NumRe), (0, 0), (0, 0)))

    rel_all = jnp.stack([_lay_rel(rel_en0, None, 1),              # enRE   -> mono block
                         _lay_rel(None, rel_zh1, 1),              # zhRE   -> mono block
                         _lay_rel(rel_mu_en, rel_mu_zh, 0)],      # multiRE -> share block
                        axis=0)                                   # (3, NRp, Lp, 2C)

    # bag segment masks in global-row coordinates (NO NumRe replication)
    pos = jnp.arange(Lp)[None, :]
    m_en = (pos >= s_en[:, None]) & (pos < e_en[:, None])         # (NumIn, Lp)
    m_zh = (pos >= (Le + s_zh)[:, None]) & (pos < (Le + e_zh)[:, None])
    mask_all = jnp.stack([m_en, m_zh, m_en | m_zh], axis=0).astype(jnp.float32)

    rv0 = _rvec(rel_en0, s_en, lEn)                               # (NumIn, NumRe, E)
    rv1 = _rvec(rel_zh1, s_zh, lZh)
    rv2 = jnp.where((lEn > 0)[:, None, None],
                    jnp.transpose(rel_mu_en[:, s_en, :], (1, 0, 2)),
                    jnp.where((lZh > 0)[:, None, None],
                              jnp.transpose(rel_mu_zh[:, s_zh, :], (1, 0, 2)),
                              0.0))
    # TODO(synk): PyTorch's `else: exit()` (both segments empty) has no kernel
    # equivalent; such bags yield R_vec=0 / S=0 instead of aborting.

    def _lay_rvec(rv, blk):
        full = jnp.zeros((NumIn, NumRe, C2), jnp.float32)
        full = full.at[:, :, blk * E:(blk + 1) * E].set(rv)
        return jnp.pad(full, ((0, 0), (0, NRp - NumRe), (0, 0)))

    rvec_all = jnp.stack([_lay_rvec(rv0, 1), _lay_rvec(rv1, 1), _lay_rvec(rv2, 0)],
                         axis=0)                                  # (3, NumIn, NRp, 2C)

    def _lay_mw(mw, blk):
        full = jnp.zeros((C2, LANE), jnp.float32)
        return full.at[blk * E:(blk + 1) * E, :dimR].set(mw)

    mw_all = jnp.stack([_lay_mw(params['enRE']['M_w'], 1),
                        _lay_mw(params['zhRE']['M_w'], 1),
                        _lay_mw(params['multiRE']['M_w'], 0)], axis=0)   # (3, 2C, 128)
    mb_all = jnp.stack([jnp.pad(params[h]['M_b'], ((0, 0), (0, LANE - dimR)))
                        for h in ('enRE', 'zhRE', 'multiRE')], axis=0)   # (3, 1, 128)

    out = pl.pallas_call(
        _mare_kernel,
        out_shape=jax.ShapeDtypeStruct((NumIn * NRp, LANE), jnp.float32),
    )(xcols, w, b_rows, tmask, rel_all, mask_all, rvec_all, mw_all, mb_all)

    pn = out.reshape(NumIn, NRp, LANE)[:, :NumRe, :dimR]          # head-summed log-probs
    midx = jnp.argmax(re_mask, axis=2).astype(jnp.int32)          # one True per (i, j)
    return jnp.take_along_axis(pn, midx[..., None], axis=2)[..., 0]


# ----------------------------------------------------------------------
# Pure-JAX reference (for correctness check)
# ----------------------------------------------------------------------
def _ref_encoder(p, words, pos1, pos2):
    x = _embed(p, words, pos1, pos2)                              # (L, S, D)
    L, S, _ = x.shape
    K = filter_size
    T = S - K + 1
    conv = jnp.zeros((L, T, dimC), jnp.float32) + p['conv_b']
    for k in range(K):
        conv = conv + jnp.einsum('ltd,dc->ltc', x[:, k:k + T, :], p['conv_w'][k])
    return jnp.tanh(jnp.max(conv, axis=1))


def _ref_head_pn(rel, inp, starts1, ends1, starts2, ends2, rvec, mw, mb):
    NumRe, Len, _ = rel.shape
    NumIn = starts1.shape[0]
    attn = jnp.sum(rel * inp[None], axis=2)                       # (NumRe, Len)
    pos = jnp.arange(Len)[None, :]
    pns = []
    for i in range(NumIn):
        m = (((pos >= starts1[i]) & (pos < ends1[i])) |
             ((pos >= starts2[i]) & (pos < ends2[i])))
        logits = jnp.where(m, attn, -1e30)
        mx = jnp.max(logits, axis=1, keepdims=True)
        e = jnp.exp(logits - mx) * m
        den = jnp.sum(e, axis=1, keepdims=True)
        att = e / jnp.where(den > 0, den, 1.0)
        S = att @ inp
        scores = S @ mw + mb + jnp.sum(rvec[i] * S, axis=1, keepdims=True)
        pns.append(jax.nn.log_softmax(scores, axis=1))
    return jnp.stack(pns)                                         # (NumIn, NumRe, dimR)


def ref_forward(params, wordsEn, pos1En, pos2En, rEn, lEn,
                wordsZh, pos1Zh, pos2Zh, rZh, lZh, re_mask):
    midx = jnp.argmax(re_mask, axis=2).astype(jnp.int32)
    share_en = _ref_encoder(params['share_en'], wordsEn, pos1En, pos2En)
    mono_en = _ref_encoder(params['mono_en'], wordsEn, pos1En, pos2En)
    share_zh = _ref_encoder(params['share_zh'], wordsZh, pos1Zh, pos2Zh)
    mono_zh = _ref_encoder(params['mono_zh'], wordsZh, pos1Zh, pos2Zh)

    s_en, e_en = _segments(lEn)
    s_zh, e_zh = _segments(lZh)
    Len_en = mono_en.shape[0]
    zero = jnp.zeros_like(s_en)

    rel_en = params['enRE']['rel_emb'][rEn]
    pn = _ref_head_pn(rel_en, mono_en, s_en, e_en, zero, zero,
                      _rvec(rel_en, s_en, lEn),
                      params['enRE']['M_w'], params['enRE']['M_b'])

    rel_zh = params['zhRE']['rel_emb'][rZh]
    pn = pn + _ref_head_pn(rel_zh, mono_zh, s_zh, e_zh, zero, zero,
                           _rvec(rel_zh, s_zh, lZh),
                           params['zhRE']['M_w'], params['zhRE']['M_b'])

    rel_m_en = params['multiRE']['rel_emb'][rEn]
    rel_m_zh = params['multiRE']['rel_emb'][rZh]
    rel_m = jnp.concatenate([rel_m_en, rel_m_zh], axis=1)
    inp_m = jnp.concatenate([share_en, share_zh], axis=0)
    rvec_m = jnp.where((lEn > 0)[:, None, None],
                       jnp.transpose(rel_m_en[:, s_en, :], (1, 0, 2)),
                       jnp.where((lZh > 0)[:, None, None],
                                 jnp.transpose(rel_m_zh[:, s_zh, :], (1, 0, 2)),
                                 0.0))
    pn = pn + _ref_head_pn(rel_m, inp_m, s_en, e_en,
                           Len_en + s_zh, Len_en + e_zh, rvec_m,
                           params['multiRE']['M_w'], params['multiRE']['M_b'])
    return jnp.take_along_axis(pn, midx[..., None], axis=2)[..., 0]


# ----------------------------------------------------------------------
# Deterministic parameter init
# ----------------------------------------------------------------------
def init_params(key):
    ks = iter(jax.random.split(key, 32))

    def nrm(shape, scale=0.1):
        return (scale * jax.random.normal(next(ks), shape)).astype(jnp.float32)

    D = D_EMB
    emb_en = nrm((VOCAB_EN, dimWE))
    emb_zh = nrm((VOCAB_ZH, dimWE))

    def enc(word_emb):
        return dict(word_emb=word_emb,
                    pos1_emb=nrm((MaxPos, dimWPE)),
                    pos2_emb=nrm((MaxPos, dimWPE)),
                    conv_w=nrm((filter_size, D, dimC)),
                    conv_b=nrm((1, dimC)))

    def re_params():
        return dict(rel_emb=nrm((dimR, Encodered_dim)),
                    M_w=nrm((Encodered_dim, dimR)),
                    M_b=nrm((1, dimR)))

    return dict(share_en=enc(emb_en), share_zh=enc(emb_zh),
                mono_en=enc(emb_en), mono_zh=enc(emb_zh),
                enRE=re_params(), zhRE=re_params(), multiRE=re_params())


if __name__ == "__main__":
    key = jax.random.PRNGKey(0)
    pkey, dkey = jax.random.split(key)
    params = init_params(pkey)

    NumIn, NumRe = 2, 4
    Len_en, Len_zh = 5, 5
    ks = jax.random.split(dkey, 10)

    wordsEn = jax.random.randint(ks[0], (Len_en, SenLen[0]), 0, VOCAB_EN, dtype=jnp.int32)
    pos1En = jax.random.randint(ks[1], (Len_en, SenLen[0]), 0, MaxPos, dtype=jnp.int32)
    pos2En = jax.random.randint(ks[2], (Len_en, SenLen[0]), 0, MaxPos, dtype=jnp.int32)
    wordsZh = jax.random.randint(ks[3], (Len_zh, SenLen[1]), 0, VOCAB_ZH, dtype=jnp.int32)
    pos1Zh = jax.random.randint(ks[4], (Len_zh, SenLen[1]), 0, MaxPos, dtype=jnp.int32)
    pos2Zh = jax.random.randint(ks[5], (Len_zh, SenLen[1]), 0, MaxPos, dtype=jnp.int32)
    rEn = jax.random.randint(ks[6], (NumRe, Len_en), 0, dimR, dtype=jnp.int32)
    rZh = jax.random.randint(ks[7], (NumRe, Len_zh), 0, dimR, dtype=jnp.int32)
    lEn = jnp.array([3, 2], dtype=jnp.int32)   # bags partition the en sentences
    lZh = jnp.array([2, 3], dtype=jnp.int32)   # bags partition the zh sentences
    mask_idx = jax.random.randint(ks[8], (NumIn, NumRe), 0, dimR, dtype=jnp.int32)
    re_mask = (mask_idx[..., None] == jnp.arange(dimR)[None, None, :])  # one True per (i,j)

    args = (wordsEn, pos1En, pos2En, rEn, lEn,
            wordsZh, pos1Zh, pos2Zh, rZh, lZh, re_mask)

    out = jax.jit(mare_forward)(params, *args)
    out = jax.block_until_ready(out)
    assert out.shape == (NumIn, NumRe), out.shape
    assert bool(jnp.all(jnp.isfinite(out)))

    ref = ref_forward(params, *args)
    ref = jax.block_until_ready(ref)
    # tolerance relaxed vs 2e-3: the kernel uses the EUP approximate reciprocal
    # for the attention softmax denominator (per perf review); everything else
    # is f32.
    assert jnp.allclose(out, ref, atol=2e-2, rtol=2e-2), (out, ref)

    print("KERNEL_OK")
</pallas_src>

<mosaic_0001>
module attributes {stable_mosaic.version = 11 : i64} {
  func.func @_mare_kernel(%arg0: memref<256x288xf32, #tpu.memory_space<vmem>>, %arg1: memref<288x64xf32, #tpu.memory_space<vmem>>, %arg2: memref<16x1x64xf32, #tpu.memory_space<vmem>>, %arg3: memref<16x16x1xf32, #tpu.memory_space<vmem>>, %arg4: memref<3x8x16x64xf32, #tpu.memory_space<vmem>>, %arg5: memref<3x2x16xf32, #tpu.memory_space<vmem>>, %arg6: memref<3x2x8x64xf32, #tpu.memory_space<vmem>>, %arg7: memref<3x64x128xf32, #tpu.memory_space<vmem>>, %arg8: memref<3x1x128xf32, #tpu.memory_space<vmem>>, %arg9: memref<16x128xf32, #tpu.memory_space<vmem>>) attributes {dimension_semantics = [], scalar_prefetch = 0 : i64, scratch_operands = 0 : i64, tpu.core_type = #tpu.core_type<tc>} {
    %c0 = arith.constant 0 : index
    %c0_0 = arith.constant 0 : index
    %0 = vector.load %arg0[%c0, %c0_0] : memref<256x288xf32, #tpu.memory_space<vmem>>, vector<256x288xf32>
    %c0_1 = arith.constant 0 : index
    %c0_2 = arith.constant 0 : index
    %1 = vector.load %arg1[%c0_1, %c0_2] : memref<288x64xf32, #tpu.memory_space<vmem>>, vector<288x64xf32>
    %cst = arith.constant dense<0.000000e+00> : vector<256x64xf32>
    %2 = tpu.matmul %0, %1, %cst {dimension_numbers = #tpu.dot_dimension_numbers<[1], [0], [0], [1], [0, 0, 1, 1], [], []>} : vector<256x288xf32>, vector<288x64xf32>, vector<256x64xf32> -> vector<256x64xf32>
    %3 = vector.shape_cast %2 : vector<256x64xf32> to vector<16x16x64xf32>
    %c0_3 = arith.constant 0 : index
    %c0_4 = arith.constant 0 : index
    %c0_5 = arith.constant 0 : index
    %4 = vector.load %arg2[%c0_3, %c0_4, %c0_5] : memref<16x1x64xf32, #tpu.memory_space<vmem>>, vector<16x1x64xf32>
    %5 = vector.broadcast %4 : vector<16x1x64xf32> to vector<16x16x64xf32>
    %6 = arith.addf %3, %5 : vector<16x16x64xf32>
    %c0_6 = arith.constant 0 : index
    %c0_7 = arith.constant 0 : index
    %c0_8 = arith.constant 0 : index
    %7 = vector.load %arg3[%c0_6, %c0_7, %c0_8] : memref<16x16x1xf32, #tpu.memory_space<vmem>>, vector<16x16x1xf32>
    %cst_9 = arith.constant 0.000000e+00 : f32
    %8 = vector.broadcast %cst_9 : f32 to vector<16x16x1xf32>
    %9 = arith.cmpf ogt, %7, %8 : vector<16x16x1xf32>
    %cst_10 = arith.constant -1.000000e+30 : f32
    %10 = vector.shape_cast %9 : vector<16x16x1xi1> to vector<16x16x1xi1>
    %11 = vector.broadcast %10 : vector<16x16x1xi1> to vector<16x16x64xi1>
    %12 = vector.broadcast %cst_10 : f32 to vector<16x16x64xf32>
    %13 = arith.select %11, %6, %12 : vector<16x16x64xi1>, vector<16x16x64xf32>
    %cst_11 = arith.constant dense<0xFF800000> : vector<16x64xf32>
    %14 = vector.multi_reduction <maximumf>, %13, %cst_11 [1] : vector<16x16x64xf32> to vector<16x64xf32>
    %15 = math.tanh %14 : vector<16x64xf32>
    %16 = tpu.iota {dimensions = array<i32: 1>} : vector<16x128xi32>
    %c8_i32 = arith.constant 8 : i32
    %17 = vector.broadcast %c8_i32 : i32 to vector<16x128xi32>
    %18 = arith.cmpi slt, %16, %17 : vector<16x128xi32>
    %cst_12 = arith.constant 0.000000e+00 : f32
    %19 = vector.broadcast %cst_12 : f32 to vector<16x128xf32>
    %c0_13 = arith.constant 0 : index
    %c0_14 = arith.constant 0 : index
    %c0_15 = arith.constant 0 : index
    %c0_16 = arith.constant 0 : index
    %20 = vector.load %arg4[%c0_13, %c0_14, %c0_15, %c0_16] : memref<3x8x16x64xf32, #tpu.memory_space<vmem>>, vector<1x8x16x64xf32>
    %21 = vector.shape_cast %20 : vector<1x8x16x64xf32> to vector<8x16x64xf32>
    %c0_17 = arith.constant 0 : index
    %c0_18 = arith.constant 0 : index
    %c0_19 = arith.constant 0 : index
    %22 = vector.load %arg5[%c0_17, %c0_18, %c0_19] : memref<3x2x16xf32, #tpu.memory_space<vmem>>, vector<1x2x16xf32>
    %23 = vector.shape_cast %22 : vector<1x2x16xf32> to vector<2x16xf32>
    %24 = vector.shape_cast %15 : vector<16x64xf32> to vector<1x16x64xf32>
    %25 = vector.broadcast %24 : vector<1x16x64xf32> to vector<8x16x64xf32>
    %26 = arith.mulf %21, %25 : vector<8x16x64xf32>
    %cst_20 = arith.constant dense<0.000000e+00> : vector<8x16xf32>
    %27 = vector.multi_reduction <add>, %26, %cst_20 [2] : vector<8x16x64xf32> to vector<8x16xf32>
    %28 = vector.shape_cast %23 : vector<2x16xf32> to vector<2x1x16xf32>
    %cst_21 = arith.constant 0.000000e+00 : f32
    %29 = vector.broadcast %cst_21 : f32 to vector<2x1x16xf32>
    %30 = arith.cmpf ogt, %28, %29 : vector<2x1x16xf32>
    %31 = vector.shape_cast %27 : vector<8x16xf32> to vector<1x8x16xf32>
    %cst_22 = arith.constant -1.000000e+30 : f32
    %32 = vector.shape_cast %30 : vector<2x1x16xi1> to vector<2x1x16xi1>
    %33 = vector.broadcast %32 : vector<2x1x16xi1> to vector<2x8x16xi1>
    %34 = vector.shape_cast %31 : vector<1x8x16xf32> to vector<1x8x16xf32>
    %35 = vector.broadcast %34 : vector<1x8x16xf32> to vector<2x8x16xf32>
    %36 = vector.broadcast %cst_22 : f32 to vector<2x8x16xf32>
    %37 = arith.select %33, %35, %36 : vector<2x8x16xi1>, vector<2x8x16xf32>
    %cst_23 = arith.constant dense<0xFF800000> : vector<2x8xf32>
    %38 = vector.multi_reduction <maximumf>, %37, %cst_23 [2] : vector<2x8x16xf32> to vector<2x8xf32>
    %39 = vector.shape_cast %38 : vector<2x8xf32> to vector<2x8x1xf32>
    %40 = vector.broadcast %39 : vector<2x8x1xf32> to vector<2x8x16xf32>
    %41 = arith.subf %37, %40 : vector<2x8x16xf32>
    %42 = math.exp %41 : vector<2x8x16xf32>
    %43 = vector.shape_cast %23 : vector<2x16xf32> to vector<2x1x16xf32>
    %44 = vector.broadcast %43 : vector<2x1x16xf32> to vector<2x8x16xf32>
    %45 = arith.mulf %42, %44 : vector<2x8x16xf32>
    %cst_24 = arith.constant dense<0.000000e+00> : vector<2x8xf32>
    %46 = vector.multi_reduction <add>, %45, %cst_24 [2] : vector<2x8x16xf32> to vector<2x8xf32>
    %47 = vector.shape_cast %46 : vector<2x8xf32> to vector<2x8x1xf32>
    %cst_25 = arith.constant 0.000000e+00 : f32
    %48 = vector.broadcast %cst_25 : f32 to vector<2x8x1xf32>
    %49 = arith.cmpf ogt, %47, %48 : vector<2x8x1xf32>
    %cst_26 = arith.constant 1.000000e+00 : f32
    %50 = vector.broadcast %cst_26 : f32 to vector<2x8x1xf32>
    %51 = arith.select %49, %47, %50 : vector<2x8x1xi1>, vector<2x8x1xf32>
    %52 = tpu.reciprocal %51 {approx = true} : vector<2x8x1xf32> -> vector<2x8x1xf32>
    %53 = vector.broadcast %52 : vector<2x8x1xf32> to vector<2x8x16xf32>
    %54 = arith.mulf %45, %53 : vector<2x8x16xf32>
    %55 = vector.shape_cast %54 : vector<2x8x16xf32> to vector<16x16xf32>
    %cst_27 = arith.constant dense<0.000000e+00> : vector<16x64xf32>
    %56 = tpu.matmul %55, %15, %cst_27 {dimension_numbers = #tpu.dot_dimension_numbers<[1], [0], [0], [1], [0, 0, 1, 1], [], []>} : vector<16x16xf32>, vector<16x64xf32>, vector<16x64xf32> -> vector<16x64xf32>
    %c0_28 = arith.constant 0 : index
    %c0_29 = arith.constant 0 : index
    %c0_30 = arith.constant 0 : index
    %c0_31 = arith.constant 0 : index
    %57 = vector.load %arg6[%c0_28, %c0_29, %c0_30, %c0_31] : memref<3x2x8x64xf32, #tpu.memory_space<vmem>>, vector<1x2x8x64xf32>
    %58 = vector.shape_cast %57 : vector<1x2x8x64xf32> to vector<2x8x64xf32>
    %59 = vector.shape_cast %58 : vector<2x8x64xf32> to vector<16x64xf32>
    %c0_32 = arith.constant 0 : index
    %c0_33 = arith.constant 0 : index
    %c0_34 = arith.constant 0 : index
    %60 = vector.load %arg7[%c0_32, %c0_33, %c0_34] : memref<3x64x128xf32, #tpu.memory_space<vmem>>, vector<1x64x128xf32>
    %61 = vector.shape_cast %60 : vector<1x64x128xf32> to vector<64x128xf32>
    %cst_35 = arith.constant dense<0.000000e+00> : vector<16x128xf32>
    %62 = tpu.matmul %56, %61, %cst_35 {dimension_numbers = #tpu.dot_dimension_numbers<[1], [0], [0], [1], [0, 0, 1, 1], [], []>} : vector<16x64xf32>, vector<64x128xf32>, vector<16x128xf32> -> vector<16x128xf32>
    %c0_36 = arith.constant 0 : index
    %c0_37 = arith.constant 0 : index
    %c0_38 = arith.constant 0 : index
    %63 = vector.load %arg8[%c0_36, %c0_37, %c0_38] : memref<3x1x128xf32, #tpu.memory_space<vmem>>, vector<1x1x128xf32>
    %64 = vector.shape_cast %63 : vector<1x1x128xf32> to vector<1x128xf32>
    %65 = vector.broadcast %64 : vector<1x128xf32> to vector<16x128xf32>
    %66 = arith.addf %62, %65 : vector<16x128xf32>
    %67 = arith.mulf %59, %56 : vector<16x64xf32>
    %cst_39 = arith.constant dense<0.000000e+00> : vector<16xf32>
    %68 = vector.multi_reduction <add>, %67, %cst_39 [1] : vector<16x64xf32> to vector<16xf32>
    %69 = vector.shape_cast %68 : vector<16xf32> to vector<16x1xf32>
    %70 = vector.broadcast %69 : vector<16x1xf32> to vector<16x128xf32>
    %71 = arith.addf %66, %70 : vector<16x128xf32>
    %cst_40 = arith.constant -1.000000e+30 : f32
    %72 = vector.broadcast %cst_40 : f32 to vector<16x128xf32>
    %73 = arith.select %18, %71, %72 : vector<16x128xi1>, vector<16x128xf32>
    %cst_41 = arith.constant dense<0xFF800000> : vector<16xf32>
    %74 = vector.multi_reduction <maximumf>, %73, %cst_41 [1] : vector<16x128xf32> to vector<16xf32>
    %75 = vector.shape_cast %74 : vector<16xf32> to vector<16x1xf32>
    %76 = vector.broadcast %75 : vector<16x1xf32> to vector<16x128xf32>
    %77 = arith.subf %73, %76 : vector<16x128xf32>
    %78 = math.exp %77 : vector<16x128xf32>
    %cst_42 = arith.constant dense<0.000000e+00> : vector<16xf32>
    %79 = vector.multi_reduction <add>, %78, %cst_42 [1] : vector<16x128xf32> to vector<16xf32>
    %80 = vector.shape_cast %79 : vector<16xf32> to vector<16x1xf32>
    %81 = math.log %80 : vector<16x1xf32>
    %82 = arith.addf %81, %75 : vector<16x1xf32>
    %83 = vector.broadcast %82 : vector<16x1xf32> to vector<16x128xf32>
    %84 = arith.subf %71, %83 : vector<16x128xf32>
    %85 = arith.addf %19, %84 : vector<16x128xf32>
    %c1 = arith.constant 1 : index
    %c0_43 = arith.constant 0 : index
    %c0_44 = arith.constant 0 : index
    %c0_45 = arith.constant 0 : index
    %86 = vector.load %arg4[%c1, %c0_43, %c0_44, %c0_45] : memref<3x8x16x64xf32, #tpu.memory_space<vmem>>, vector<1x8x16x64xf32>
    %87 = vector.shape_cast %86 : vector<1x8x16x64xf32> to vector<8x16x64xf32>
    %c1_46 = arith.constant 1 : index
    %c0_47 = arith.constant 0 : index
    %c0_48 = arith.constant 0 : index
    %88 = vector.load %arg5[%c1_46, %c0_47, %c0_48] : memref<3x2x16xf32, #tpu.memory_space<vmem>>, vector<1x2x16xf32>
    %89 = vector.shape_cast %88 : vector<1x2x16xf32> to vector<2x16xf32>
    %90 = vector.shape_cast %15 : vector<16x64xf32> to vector<1x16x64xf32>
    %91 = vector.broadcast %90 : vector<1x16x64xf32> to vector<8x16x64xf32>
    %92 = arith.mulf %87, %91 : vector<8x16x64xf32>
    %cst_49 = arith.constant dense<0.000000e+00> : vector<8x16xf32>
    %93 = vector.multi_reduction <add>, %92, %cst_49 [2] : vector<8x16x64xf32> to vector<8x16xf32>
    %94 = vector.shape_cast %89 : vector<2x16xf32> to vector<2x1x16xf32>
    %cst_50 = arith.constant 0.000000e+00 : f32
    %95 = vector.broadcast %cst_50 : f32 to vector<2x1x16xf32>
    %96 = arith.cmpf ogt, %94, %95 : vector<2x1x16xf32>
    %97 = vector.shape_cast %93 : vector<8x16xf32> to vector<1x8x16xf32>
    %cst_51 = arith.constant -1.000000e+30 : f32
    %98 = vector.shape_cast %96 : vector<2x1x16xi1> to vector<2x1x16xi1>
    %99 = vector.broadcast %98 : vector<2x1x16xi1> to vector<2x8x16xi1>
    %100 = vector.shape_cast %97 : vector<1x8x16xf32> to vector<1x8x16xf32>
    %101 = vector.broadcast %100 : vector<1x8x16xf32> to vector<2x8x16xf32>
    %102 = vector.broadcast %cst_51 : f32 to vector<2x8x16xf32>
    %103 = arith.select %99, %101, %102 : vector<2x8x16xi1>, vector<2x8x16xf32>
    %cst_52 = arith.constant dense<0xFF800000> : vector<2x8xf32>
    %104 = vector.multi_reduction <maximumf>, %103, %cst_52 [2] : vector<2x8x16xf32> to vector<2x8xf32>
    %105 = vector.shape_cast %104 : vector<2x8xf32> to vector<2x8x1xf32>
    %106 = vector.broadcast %105 : vector<2x8x1xf32> to vector<2x8x16xf32>
    %107 = arith.subf %103, %106 : vector<2x8x16xf32>
    %108 = math.exp %107 : vector<2x8x16xf32>
    %109 = vector.shape_cast %89 : vector<2x16xf32> to vector<2x1x16xf32>
    %110 = vector.broadcast %109 : vector<2x1x16xf32> to vector<2x8x16xf32>
    %111 = arith.mulf %108, %110 : vector<2x8x16xf32>
    %cst_53 = arith.constant dense<0.000000e+00> : vector<2x8xf32>
    %112 = vector.multi_reduction <add>, %111, %cst_53 [2] : vector<2x8x16xf32> to vector<2x8xf32>
    %113 = vector.shape_cast %112 : vector<2x8xf32> to vector<2x8x1xf32>
    %cst_54 = arith.constant 0.000000e+00 : f32
    %114 = vector.broadcast %cst_54 : f32 to vector<2x8x1xf32>
    %115 = arith.cmpf ogt, %113, %114 : vector<2x8x1xf32>
    %cst_55 = arith.constant 1.000000e+00 : f32
    %116 = vector.broadcast %cst_55 : f32 to vector<2x8x1xf32>
    %117 = arith.select %115, %113, %116 : vector<2x8x1xi1>, vector<2x8x1xf32>
    %118 = tpu.reciprocal %117 {approx = true} : vector<2x8x1xf32> -> vector<2x8x1xf32>
    %119 = vector.broadcast %118 : vector<2x8x1xf32> to vector<2x8x16xf32>
    %120 = arith.mulf %111, %119 : vector<2x8x16xf32>
    %121 = vector.shape_cast %120 : vector<2x8x16xf32> to vector<16x16xf32>
    %cst_56 = arith.constant dense<0.000000e+00> : vector<16x64xf32>
    %122 = tpu.matmul %121, %15, %cst_56 {dimension_numbers = #tpu.dot_dimension_numbers<[1], [0], [0], [1], [0, 0, 1, 1], [], []>} : vector<16x16xf32>, vector<16x64xf32>, vector<16x64xf32> -> vector<16x64xf32>
    %c1_57 = arith.constant 1 : index
    %c0_58 = arith.constant 0 : index
    %c0_59 = arith.constant 0 : index
    %c0_60 = arith.constant 0 : index
    %123 = vector.load %arg6[%c1_57, %c0_58, %c0_59, %c0_60] : memref<3x2x8x64xf32, #tpu.memory_space<vmem>>, vector<1x2x8x64xf32>
    %124 = vector.shape_cast %123 : vector<1x2x8x64xf32> to vector<2x8x64xf32>
    %125 = vector.shape_cast %124 : vector<2x8x64xf32> to vector<16x64xf32>
    %c1_61 = arith.constant 1 : index
    %c0_62 = arith.constant 0 : index
    %c0_63 = arith.constant 0 : index
    %126 = vector.load %arg7[%c1_61, %c0_62, %c0_63] : memref<3x64x128xf32, #tpu.memory_space<vmem>>, vector<1x64x128xf32>
    %127 = vector.shape_cast %126 : vector<1x64x128xf32> to vector<64x128xf32>
    %cst_64 = arith.constant dense<0.000000e+00> : vector<16x128xf32>
    %128 = tpu.matmul %122, %127, %cst_64 {dimension_numbers = #tpu.dot_dimension_numbers<[1], [0], [0], [1], [0, 0, 1, 1], [], []>} : vector<16x64xf32>, vector<64x128xf32>, vector<16x128xf32> -> vector<16x128xf32>
    %c1_65 = arith.constant 1 : index
    %c0_66 = arith.constant 0 : index
    %c0_67 = arith.constant 0 : index
    %129 = vector.load %arg8[%c1_65, %c0_66, %c0_67] : memref<3x1x128xf32, #tpu.memory_space<vmem>>, vector<1x1x128xf32>
    %130 = vector.shape_cast %129 : vector<1x1x128xf32> to vector<1x128xf32>
    %131 = vector.broadcast %130 : vector<1x128xf32> to vector<16x128xf32>
    %132 = arith.addf %128, %131 : vector<16x128xf32>
    %133 = arith.mulf %125, %122 : vector<16x64xf32>
    %cst_68 = arith.constant dense<0.000000e+00> : vector<16xf32>
    %134 = vector.multi_reduction <add>, %133, %cst_68 [1] : vector<16x64xf32> to vector<16xf32>
    %135 = vector.shape_cast %134 : vector<16xf32> to vector<16x1xf32>
    %136 = vector.broadcast %135 : vector<16x1xf32> to vector<16x128xf32>
    %137 = arith.addf %132, %136 : vector<16x128xf32>
    %cst_69 = arith.constant -1.000000e+30 : f32
    %138 = vector.broadcast %cst_69 : f32 to vector<16x128xf32>
    %139 = arith.select %18, %137, %138 : vector<16x128xi1>, vector<16x128xf32>
    %cst_70 = arith.constant dense<0xFF800000> : vector<16xf32>
    %140 = vector.multi_reduction <maximumf>, %139, %cst_70 [1] : vector<16x128xf32> to vector<16xf32>
    %141 = vector.shape_cast %140 : vector<16xf32> to vector<16x1xf32>
    %142 = vector.broadcast %141 : vector<16x1xf32> to vector<16x128xf32>
    %143 = arith.subf %139, %142 : vector<16x128xf32>
    %144 = math.exp %143 : vector<16x128xf32>
    %cst_71 = arith.constant dense<0.000000e+00> : vector<16xf32>
    %145 = vector.multi_reduction <add>, %144, %cst_71 [1] : vector<16x128xf32> to vector<16xf32>
    %146 = vector.shape_cast %145 : vector<16xf32> to vector<16x1xf32>
    %147 = math.log %146 : vector<16x1xf32>
    %148 = arith.addf %147, %141 : vector<16x1xf32>
    %149 = vector.broadcast %148 : vector<16x1xf32> to vector<16x128xf32>
    %150 = arith.subf %137, %149 : vector<16x128xf32>
    %151 = arith.addf %85, %150 : vector<16x128xf32>
    %c2 = arith.constant 2 : index
    %c0_72 = arith.constant 0 : index
    %c0_73 = arith.constant 0 : index
    %c0_74 = arith.constant 0 : index
    %152 = vector.load %arg4[%c2, %c0_72, %c0_73, %c0_74] : memref<3x8x16x64xf32, #tpu.memory_space<vmem>>, vector<1x8x16x64xf32>
    %153 = vector.shape_cast %152 : vector<1x8x16x64xf32> to vector<8x16x64xf32>
    %c2_75 = arith.constant 2 : index
    %c0_76 = arith.constant 0 : index
    %c0_77 = arith.constant 0 : index
    %154 = vector.load %arg5[%c2_75, %c0_76, %c0_77] : memref<3x2x16xf32, #tpu.memory_space<vmem>>, vector<1x2x16xf32>
    %155 = vector.shape_cast %154 : vector<1x2x16xf32> to vector<2x16xf32>
    %156 = vector.shape_cast %15 : vector<16x64xf32> to vector<1x16x64xf32>
    %157 = vector.broadcast %156 : vector<1x16x64xf32> to vector<8x16x64xf32>
    %158 = arith.mulf %153, %157 : vector<8x16x64xf32>
    %cst_78 = arith.constant dense<0.000000e+00> : vector<8x16xf32>
    %159 = vector.multi_reduction <add>, %158, %cst_78 [2] : vector<8x16x64xf32> to vector<8x16xf32>
    %160 = vector.shape_cast %155 : vector<2x16xf32> to vector<2x1x16xf32>
    %cst_79 = arith.constant 0.000000e+00 : f32
    %161 = vector.broadcast %cst_79 : f32 to vector<2x1x16xf32>
    %162 = arith.cmpf ogt, %160, %161 : vector<2x1x16xf32>
    %163 = vector.shape_cast %159 : vector<8x16xf32> to vector<1x8x16xf32>
    %cst_80 = arith.constant -1.000000e+30 : f32
    %164 = vector.shape_cast %162 : vector<2x1x16xi1> to vector<2x1x16xi1>
    %165 = vector.broadcast %164 : vector<2x1x16xi1> to vector<2x8x16xi1>
    %166 = vector.shape_cast %163 : vector<1x8x16xf32> to vector<1x8x16xf32>
    %167 = vector.broadcast %166 : vector<1x8x16xf32> to vector<2x8x16xf32>
    %168 = vector.broadcast %cst_80 : f32 to vector<2x8x16xf32>
    %169 = arith.select %165, %167, %168 : vector<2x8x16xi1>, vector<2x8x16xf32>
    %cst_81 = arith.constant dense<0xFF800000> : vector<2x8xf32>
    %170 = vector.multi_reduction <maximumf>, %169, %cst_81 [2] : vector<2x8x16xf32> to vector<2x8xf32>
    %171 = vector.shape_cast %170 : vector<2x8xf32> to vector<2x8x1xf32>
    %172 = vector.broadcast %171 : vector<2x8x1xf32> to vector<2x8x16xf32>
    %173 = arith.subf %169, %172 : vector<2x8x16xf32>
    %174 = math.exp %173 : vector<2x8x16xf32>
    %175 = vector.shape_cast %155 : vector<2x16xf32> to vector<2x1x16xf32>
    %176 = vector.broadcast %175 : vector<2x1x16xf32> to vector<2x8x16xf32>
    %177 = arith.mulf %174, %176 : vector<2x8x16xf32>
    %cst_82 = arith.constant dense<0.000000e+00> : vector<2x8xf32>
    %178 = vector.multi_reduction <add>, %177, %cst_82 [2] : vector<2x8x16xf32> to vector<2x8xf32>
    %179 = vector.shape_cast %178 : vector<2x8xf32> to vector<2x8x1xf32>
    %cst_83 = arith.constant 0.000000e+00 : f32
    %180 = vector.broadcast %cst_83 : f32 to vector<2x8x1xf32>
    %181 = arith.cmpf ogt, %179, %180 : vector<2x8x1xf32>
    %cst_84 = arith.constant 1.000000e+00 : f32
    %182 = vector.broadcast %cst_84 : f32 to vector<2x8x1xf32>
    %183 = arith.select %181, %179, %182 : vector<2x8x1xi1>, vector<2x8x1xf32>
    %184 = tpu.reciprocal %183 {approx = true} : vector<2x8x1xf32> -> vector<2x8x1xf32>
    %185 = vector.broadcast %184 : vector<2x8x1xf32> to vector<2x8x16xf32>
    %186 = arith.mulf %177, %185 : vector<2x8x16xf32>
    %187 = vector.shape_cast %186 : vector<2x8x16xf32> to vector<16x16xf32>
    %cst_85 = arith.constant dense<0.000000e+00> : vector<16x64xf32>
    %188 = tpu.matmul %187, %15, %cst_85 {dimension_numbers = #tpu.dot_dimension_numbers<[1], [0], [0], [1], [0, 0, 1, 1], [], []>} : vector<16x16xf32>, vector<16x64xf32>, vector<16x64xf32> -> vector<16x64xf32>
    %c2_86 = arith.constant 2 : index
    %c0_87 = arith.constant 0 : index
    %c0_88 = arith.constant 0 : index
    %c0_89 = arith.constant 0 : index
    %189 = vector.load %arg6[%c2_86, %c0_87, %c0_88, %c0_89] : memref<3x2x8x64xf32, #tpu.memory_space<vmem>>, vector<1x2x8x64xf32>
    %190 = vector.shape_cast %189 : vector<1x2x8x64xf32> to vector<2x8x64xf32>
    %191 = vector.shape_cast %190 : vector<2x8x64xf32> to vector<16x64xf32>
    %c2_90 = arith.constant 2 : index
    %c0_91 = arith.constant 0 : index
    %c0_92 = arith.constant 0 : index
    %192 = vector.load %arg7[%c2_90, %c0_91, %c0_92] : memref<3x64x128xf32, #tpu.memory_space<vmem>>, vector<1x64x128xf32>
    %193 = vector.shape_cast %192 : vector<1x64x128xf32> to vector<64x128xf32>
    %cst_93 = arith.constant dense<0.000000e+00> : vector<16x128xf32>
    %194 = tpu.matmul %188, %193, %cst_93 {dimension_numbers = #tpu.dot_dimension_numbers<[1], [0], [0], [1], [0, 0, 1, 1], [], []>} : vector<16x64xf32>, vector<64x128xf32>, vector<16x128xf32> -> vector<16x128xf32>
    %c2_94 = arith.constant 2 : index
    %c0_95 = arith.constant 0 : index
    %c0_96 = arith.constant 0 : index
    %195 = vector.load %arg8[%c2_94, %c0_95, %c0_96] : memref<3x1x128xf32, #tpu.memory_space<vmem>>, vector<1x1x128xf32>
    %196 = vector.shape_cast %195 : vector<1x1x128xf32> to vector<1x128xf32>
    %197 = vector.broadcast %196 : vector<1x128xf32> to vector<16x128xf32>
    %198 = arith.addf %194, %197 : vector<16x128xf32>
    %199 = arith.mulf %191, %188 : vector<16x64xf32>
    %cst_97 = arith.constant dense<0.000000e+00> : vector<16xf32>
    %200 = vector.multi_reduction <add>, %199, %cst_97 [1] : vector<16x64xf32> to vector<16xf32>
    %201 = vector.shape_cast %200 : vector<16xf32> to vector<16x1xf32>
    %202 = vector.broadcast %201 : vector<16x1xf32> to vector<16x128xf32>
    %203 = arith.addf %198, %202 : vector<16x128xf32>
    %cst_98 = arith.constant -1.000000e+30 : f32
    %204 = vector.broadcast %cst_98 : f32 to vector<16x128xf32>
    %205 = arith.select %18, %203, %204 : vector<16x128xi1>, vector<16x128xf32>
    %cst_99 = arith.constant dense<0xFF800000> : vector<16xf32>
    %206 = vector.multi_reduction <maximumf>, %205, %cst_99 [1] : vector<16x128xf32> to vector<16xf32>
    %207 = vector.shape_cast %206 : vector<16xf32> to vector<16x1xf32>
    %208 = vector.broadcast %207 : vector<16x1xf32> to vector<16x128xf32>
    %209 = arith.subf %205, %208 : vector<16x128xf32>
    %210 = math.exp %209 : vector<16x128xf32>
    %cst_100 = arith.constant dense<0.000000e+00> : vector<16xf32>
    %211 = vector.multi_reduction <add>, %210, %cst_100 [1] : vector<16x128xf32> to vector<16xf32>
    %212 = vector.shape_cast %211 : vector<16xf32> to vector<16x1xf32>
    %213 = math.log %212 : vector<16x1xf32>
    %214 = arith.addf %213, %207 : vector<16x1xf32>
    %215 = vector.broadcast %214 : vector<16x1xf32> to vector<16x128xf32>
    %216 = arith.subf %203, %215 : vector<16x128xf32>
    %217 = arith.addf %151, %216 : vector<16x128xf32>
    %c0_101 = arith.constant 0 : index
    %c0_102 = arith.constant 0 : index
    %218 = vector.load %arg9[%c0_101, %c0_102] : memref<16x128xf32, #tpu.memory_space<vmem>>, vector<16x128xf32>
    tpu.vector_store %arg9[%c0_101, %c0_102], %217 {strides = array<i32>} : memref<16x128xf32, #tpu.memory_space<vmem>>, vector<16x128xf32>,
    return
  }
}

</mosaic_0001>

<bundles_post_ra>
// kernel: mare_forward.1
= control target key start
LH: loop header
LB: loop body
LE: loop exit
PB: predicated region body
PF: predicated region fallthrough
CT: control target
= control target key end

     0   :  { %vm164_vm0 = vcmask 261120   ;;  %v2259_v19 = vmov 0   ;;  %s3726_s1 = inlined_call_operand.vmem [shape: f32[288,64], index: 1, kind: input, shape index: {}]   ;;  %s3727_s0 = inlined_call_operand.vmem [shape: f32[256,288], index: 0, kind: input, shape index: {}]   ;;  %s3728_s3 = inlined_call_operand.vmem [shape: f32[16,16,1], index: 3, kind: input, shape index: {}]   ;;  %s3729_s2 = inlined_call_operand.vmem [shape: f32[16,1,64], index: 2, kind: input, shape index: {}]   ;;  %s3730_s4 = inlined_call_operand.vmem [shape: f32[3,8,16,64], index: 4, kind: input, shape index: {}]   ;;  %s3731_s5 = inlined_call_operand.vmem [shape: f32[3,2,16], index: 5, kind: input, shape index: {}]   ;;  %s3732_s7 = inlined_call_operand.vmem [shape: f32[3,64,128], index: 7, kind: input, shape index: {}]   ;;  %s3733_s8 = inlined_call_operand.vmem [shape: f32[3,1,128], index: 8, kind: input, shape index: {}]   ;;  %s3734_s6 = inlined_call_operand.vmem [shape: f32[3,2,8,64], index: 6, kind: input, shape index: {}]   ;;  %s3735_s9 = inlined_call_operand.vmem [shape: f32[16,128], index: 9, kind: output, shape index: {}]  }
   0x1   :  { %v143_v0 = vld [vmem:[%s3726_s1 + $0x78] sm:$0xff]  ;;  %v142_v3 = vld [vmem:[%s3726_s1 + $0x70] sm:$0xff]  ;;  %v141_v6 = vld [vmem:[%s3726_s1 + $0x68] sm:$0xff]  ;;  %2157 = vset.pattern.permute.xlu0 %v2259_v19  ;;  %2158 = vset.pattern.permute.xlu1 %v2259_v19 }
   0x2   :  { %v2316_v1 = vld [vmem:[%s3726_s1 + $0xf8] sm:$0xff]  ;;  %261 = vmatpush.msra.mxu0 %v143_v0  ;;  %v2330_v4 = vld [vmem:[%s3726_s1 + $0xf0] sm:$0xff]  ;;  %v2344_v7 = vld [vmem:[%s3726_s1 + $0xe8] sm:$0xff]  ;;  %2120 = vmatpush.msra.mxu3 %v143_v0 }
   0x3   :  { %v2321_v2 = vld [vmem:[%s3726_s1 + $0x118] sm:$0xff]  ;;  %374 = vmatpush.msra.mxu1 %v2316_v1  ;;  %v2335_v5 = vld [vmem:[%s3726_s1 + $0x110] sm:$0xff]  ;;  %v2350_v8 = vld [vmem:[%s3726_s1 + $0x108] sm:$0xff]  ;;  %2159 = vset.pattern.permute.xlu2 %v2259_v19 }
   0x4   :  { %499 = vmatpush.msra.mxu2 %v2321_v2  ;;  %262 = vmatpush.msra.mxu0 %v142_v3  ;;  %v140_v9 = vld [vmem:[%s3726_s1 + $0x60] sm:$0xff]  ;;  %v34_v12 = vld [vmem:[%s3727_s0 + $0x10] sm:$0xff]  ;;  %v139_v13 = vld [vmem:[%s3726_s1 + $0x58] sm:$0xff] }
   0x5   :  { %375 = vmatpush.msra.mxu1 %v2330_v4  ;;  %v2359_v10 = vld [vmem:[%s3726_s1 + $0xe0] sm:$0xff]  ;;  %2121 = vmatpush.msra.mxu3 %v142_v3  ;;  %v2378_v14 = vld [vmem:[%s3726_s1 + $0xd8] sm:$0xff]  ;;  %v138_v15 = vld [vmem:[%s3726_s1 + $0x50] sm:$0xff] }
   0x6   :  { %500 = vmatpush.msra.mxu2 %v2335_v5  ;;  %263 = vmatpush.msra.mxu0 %v141_v6  ;;  %v2365_v11 = vld [vmem:[%s3726_s1 + $0x100] sm:$0xff]  ;;  %v2388_v16 = vld [vmem:[%s3726_s1 + $0xd0] sm:$0xff]  ;;  %v137_v17 = vld [vmem:[%s3726_s1 + $0x48] sm:$0xff] }
   0x7   :  { %376 = vmatpush.msra.mxu1 %v2344_v7  ;;  %2122 = vmatpush.msra.mxu3 %v141_v6  ;;  %v2397_v18 = vld [vmem:[%s3726_s1 + $0xc8] sm:$0xff]  ;;  %v136_v20 = vld [vmem:[%s3726_s1 + $0x40] sm:$0xff]  ;;  %v135_v23 = vld [vmem:[%s3726_s1 + $0x38] sm:$0xff] }
   0x8   :  { %501 = vmatpush.msra.mxu2 %v2350_v8  ;;  %264 = vmatpush.msra.mxu0 %v140_v9  ;;  %v2407_v21 = vld [vmem:[%s3726_s1 + $0xc0] sm:$0xff]  ;;  %v37_v22 = vld [vmem:[%s3727_s0 + $0x28] sm:$0xff]  ;;  %v2420_v24 = vld [vmem:[%s3726_s1 + $0xb8] sm:$0xff] }
   0x9   :  { %377 = vmatpush.msra.mxu1 %v2359_v10  ;;  %2123 = vmatpush.msra.mxu3 %v140_v9  ;;  %v696_v25 = vld [vmem:[%s3728_s3] sm:$0xff]  ;;  %v134_v26 = vld [vmem:[%s3726_s1 + $0x30] sm:$0xff]  ;;  %v133_v29 = vld [vmem:[%s3726_s1 + $0x28] sm:$0xff] }
   0xa   :  { %502 = vmatpush.msra.mxu2 %v2365_v11  ;;  %265 = vmatpush.msra.mxu0 %v139_v13  ;;  %vm728_vm1 = vcmp.gt.f32.partialorder %v696_v25, 0.0  ;;  %v2434_v27 = vld [vmem:[%s3726_s1 + $0xb0] sm:$0xff]  ;;  %v697_v30 = vld [vmem:[%s3728_s3 + $0x8] sm:$0xff]  ;;  %v132_v32 = vld [vmem:[%s3726_s1 + $0x20] sm:$0xff] }
   0xb   :  { %2020 = vmatmul.msk.f32.vlgmr.msra.gmra.mxu2 %vm164_vm0, %v34_v12  ;;  %378 = vmatpush.msra.mxu1 %v2378_v14  ;;  %v760_v28 = vsel %vm728_vm1, 1, %v2259_v19  ;;  %v2447_v31 = vld [vmem:[%s3726_s1 + $0xa8] sm:$0xff]  ;;  %v2456_v33 = vld [vmem:[%s3726_s1 + $0xa0] sm:$0xff]  ;;  %vm729_vm2 = vcmp.gt.f32.partialorder %v697_v30, 0.0  ;;  %v131_v35 = vld [vmem:[%s3726_s1 + $0x18] sm:$0xff] }
   0xc   :  { %2124 = vmatpush.msra.mxu3 %v139_v13  ;;  %266 = vmatpush.msra.mxu0 %v138_v15  ;;  %v40_v34 = vld [vmem:[%s3727_s0 + $0x40] sm:$0xff]  ;;  %v2468_v36 = vld [vmem:[%s3726_s1 + $0x98] sm:$0xff]  ;;  %v130_v37 = vld [vmem:[%s3726_s1 + $0x10] sm:$0xff]  ;;  %v761_v38 = vsel %vm729_vm2, 1, %v2259_v19 }
   0xd   :  { %379 = vmatpush.msra.mxu1 %v2388_v16  ;;  %793 = vperm.xlu0 %2157, %v760_v28   ;;  %v2479_v39 = vld [vmem:[%s3726_s1 + $0x90] sm:$0xff]  ;;  %v129_v41 = vld [vmem:[%s3726_s1 + $0x8] sm:$0xff]  ;;  %v128_v44 = vld [vmem:[%s3726_s1] sm:$0xff] }
   0xe   :  { %2125 = vmatpush.msra.mxu3 %v138_v15  ;;  %267 = vmatpush.msra.mxu0 %v137_v17  ;;  %v698_v40 = vld [vmem:[%s3728_s3 + $0x10] sm:$0xff]  ;;  %v2491_v42 = vld [vmem:[%s3726_s1 + $0x88] sm:$0xff]  ;;  %v2501_v45 = vld [vmem:[%s3726_s1 + $0x80] sm:$0xff] }
   0xf   :  { %380 = vmatpush.msra.mxu1 %v2397_v18  ;;  %vm730_vm3 = vcmp.gt.f32.partialorder %v698_v40, 0.0  ;;  %v32_v46 = vld [vmem:[%s3727_s0] sm:$0xff]  ;;  %v33_v47 = vld [vmem:[%s3727_s0 + $0x8] sm:$0xff]  ;;  %v43_v48 = vld [vmem:[%s3727_s0 + $0x58] sm:$0xff] }
  0x10   :  { %2126 = vmatpush.msra.mxu3 %v137_v17  ;;  %268 = vmatpush.msra.mxu0 %v136_v20  ;;  %v762_v43 = vsel %vm730_vm3, 1, %v2259_v19  ;;  %v113_v49 = vld [vmem:[%s3727_s0 + $0x288] sm:$0xff]  ;;  %v699_v50 = vld [vmem:[%s3728_s3 + $0x18] sm:$0xff]  ;;  %v36_v53 = vld [vmem:[%s3727_s0 + $0x20] sm:$0xff] }
  0x11   :  { %381 = vmatpush.msra.mxu1 %v2407_v21  ;;  %799 = vperm.xlu1 %2158, %v762_v43   ;;  %vm731_vm4 = vcmp.gt.f32.partialorder %v699_v50, 0.0  ;;  %v35_v51 = vld [vmem:[%s3727_s0 + $0x18] sm:$0xff]  ;;  %v46_v54 = vld [vmem:[%s3727_s0 + $0x70] sm:$0xff]  ;;  %v116_v55 = vld [vmem:[%s3727_s0 + $0x2a0] sm:$0xff] }
  0x12   :  { %2127 = vmatpush.msra.mxu3 %v136_v20  ;;  %269 = vmatpush.msra.mxu0 %v135_v23  ;;  %v763_v52 = vsel %vm731_vm4, 1, %v2259_v19  ;;  %v714_v56 = vld [vmem:[%s3728_s3 + $0x90] sm:$0xff]  ;;  %v39_v59 = vld [vmem:[%s3727_s0 + $0x38] sm:$0xff]  ;;  %v49_v60 = vld [vmem:[%s3727_s0 + $0x88] sm:$0xff] }
  0x13   :  { %2021 = vmatmul.msk.f32.gmra.mxu2 %vm164_vm0, %v37_v22  ;;  %382 = vmatpush.msra.mxu1 %v2420_v24  ;;  %vm746_vm5 = vcmp.gt.f32.partialorder %v714_v56, 0.0  ;;  %v38_v58 = vld [vmem:[%s3727_s0 + $0x30] sm:$0xff]  ;;  %v119_v61 = vld [vmem:[%s3727_s0 + $0x2b8] sm:$0xff]  ;;  %v712_v62 = vld [vmem:[%s3728_s3 + $0x80] sm:$0xff] }
  0x14   :  { %2128 = vmatpush.msra.mxu3 %v135_v23  ;;  %270 = vmatpush.msra.mxu0 %v134_v26  ;;  %v778_v57 = vsel %vm746_vm5, 1, %v2259_v19  ;;  %v715_v63 = vld [vmem:[%s3728_s3 + $0x98] sm:$0xff]  ;;  %vm744_vm6 = vcmp.gt.f32.partialorder %v712_v62, 0.0  ;;  %v701_v0 = vld [vmem:[%s3728_s3 + $0x28] sm:$0xff]  ;;  %v52_v9 = vld [vmem:[%s3727_s0 + $0xa0] sm:$0xff] }
  0x15   :  { %383 = vmatpush.msra.mxu1 %v2434_v27  ;;  %796 = vperm.xlu0 %2157, %v761_v38   ;;  %vm747_vm7 = vcmp.gt.f32.partialorder %v715_v63, 0.0  ;;  %vm733_vm8 = vcmp.gt.f32.partialorder %v701_v0, 0.0  ;;  %v41_v6 = vld [vmem:[%s3727_s0 + $0x48] sm:$0xff]  ;;  %v716_v13 = vld [vmem:[%s3728_s3 + $0xa0] sm:$0xff]  ;;  %v126_v56 = vld [vmem:[%s3727_s0 + $0x2f0] sm:$0xff] }
  0x16   :  { %2129 = vmatpush.msra.mxu3 %v134_v26  ;;  %271 = vmatpush.msra.mxu0 %v133_v29  ;;  %v779_v3 = vsel %vm747_vm7, 1, %v2259_v19  ;;  %v713_v12 = vld [vmem:[%s3728_s3 + $0x88] sm:$0xff]  ;;  %vm748_vm10 = vcmp.gt.f32.partialorder %v716_v13, 0.0  ;;  %v700_v23 = vld [vmem:[%s3728_s3 + $0x20] sm:$0xff] }
  0x17   :  { %384 = vmatpush.msra.mxu1 %v2447_v31  ;;  %vm745_vm9 = vcmp.gt.f32.partialorder %v713_v12, 0.0  ;;  %v45_v20 = vld [vmem:[%s3727_s0 + $0x68] sm:$0xff]  ;;  %vm732_vm12 = vcmp.gt.f32.partialorder %v700_v23, 0.0  ;;  %v48_v28 = vld [vmem:[%s3727_s0 + $0x80] sm:$0xff]  ;;  %v727_v23 = vld [vmem:[%s3728_s3 + $0xf8] sm:$0xff] }
  0x18   :  { %2130 = vmatpush.msra.mxu3 %v133_v29  ;;  %272 = vmatpush.msra.mxu0 %v132_v32  ;;  %v777_v15 = vsel %vm745_vm9, 1, %v2259_v19  ;;  %v125_v22 = vld [vmem:[%s3727_s0 + $0x2e8] sm:$0xff]  ;;  %v764_v25 = vsel %vm732_vm12, 1, %v2259_v19  ;;  %v58_v29 = vld [vmem:[%s3727_s0 + $0xd0] sm:$0xff]  ;;  %v704_v30 = vld [vmem:[%s3728_s3 + $0x40] sm:$0xff] }
  0x19   :  { %385 = vmatpush.msra.mxu1 %v2456_v33  ;;  %802 = vperm.xlu1 %2158, %v763_v52   ;;  %vm736_vm14 = vcmp.gt.f32.partialorder %v704_v30, 0.0  ;;  %v120_v38 = vld [vmem:[%s3727_s0 + $0x2c0] sm:$0xff]  ;;  %v73_v62 = vld [vmem:[%s3727_s0 + $0x148] sm:$0xff]  ;;  %v74_v30 = vld [vmem:[%s3727_s0 + $0x150] sm:$0xff] }
  0x1a   :  { %2131 = vmatpush.msra.mxu3 %v132_v32  ;;  %273 = vmatpush.msra.mxu0 %v131_v35  ;;  %v61_v32 = vld [vmem:[%s3727_s0 + $0xe8] sm:$0xff]  ;;  %v720_v40 = vld [vmem:[%s3728_s3 + $0xc0] sm:$0xff] }
  0x1b   :  { %2022 = vmatmul.msk.f32.gmra.mxu2 %vm164_vm0, %v40_v34  ;;  %386 = vmatpush.msra.mxu1 %v2468_v36  ;;  %vm752_vm2 = vcmp.gt.f32.partialorder %v720_v40, 0.0  ;;  %v56_v43 = vld [vmem:[%s3727_s0 + $0xc0] sm:$0xff] }
  0x1c   :  { %2132 = vmatpush.msra.mxu3 %v131_v35  ;;  %274 = vmatpush.msra.mxu0 %v130_v37  ;;  %v53_v35 = vld [vmem:[%s3727_s0 + $0xa8] sm:$0xff]  ;;  %v80_v40 = vld [vmem:[%s3727_s0 + $0x180] sm:$0xff] }
  0x1d   :  { %387 = vmatpush.msra.mxu1 %v2479_v39  ;;  %847 = vperm.xlu0 %2157, %v778_v57   ;;  %v722_v57 = vld [vmem:[%s3728_s3 + $0xd0] sm:$0xff] }
  0x1e   :  { %2133 = vmatpush.msra.mxu3 %v130_v37  ;;  %275 = vmatpush.msra.mxu0 %v129_v41  ;;  %v64_v37 = vld [vmem:[%s3727_s0 + $0x100] sm:$0xff] }
  0x1f   :  { %388 = vmatpush.msra.mxu1 %v2491_v42 }
  0x20   :  { %2134 = vmatpush.msra.mxu3 %v129_v41  ;;  %276 = vmatpush.msra.mxu0 %v128_v44 }
  0x21   :  { %389 = vmatpush.msra.mxu1 %v2501_v45  ;;  %277 = vmatmul.f32.vlgmr.msra.gmra.mxu0 %v32_v46  ;;  %v123_v46 = vld [vmem:[%s3727_s0 + $0x2d8] sm:$0xff] }
  0x22   :  { %390 = vmatmul.f32.vlgmr.msra.gmra.mxu1 %v33_v47  ;;  %2135 = vmatpush.msra.mxu3 %v128_v44  ;;  %v57_v44 = vld [vmem:[%s3727_s0 + $0xc8] sm:$0xff] }
  0x23   :  { %2023 = vmatmul.msk.f32.gmra.mxu2 %vm164_vm0, %v43_v48  ;;  %358 = vmatmul.f32.vlgmr.msra.gmra.mxu3 %v113_v49  ;;  %v721_v47 = vld [vmem:[%s3728_s3 + $0xc8] sm:$0xff]  ;;  %v718_v48 = vld [vmem:[%s3728_s3 + $0xb0] sm:$0xff]  ;;  %v707_v49 = vld [vmem:[%s3728_s3 + $0x58] sm:$0xff] }
  0x24   :  { %2136 = vmatpush.msrb.mxu3 %v2316_v1  ;;  %v776_v1 = vsel %vm744_vm6, 1, %v2259_v19  ;;  %850 = vperm.xlu1 %2158, %v779_v3   ;;  %vm753_vm3 = vcmp.gt.f32.partialorder %v721_v47, 0.0  ;;  %vm750_vm4 = vcmp.gt.f32.partialorder %v718_v48, 0.0  ;;  %vm739_vm5 = vcmp.gt.f32.partialorder %v707_v49, 0.0  ;;  %v124_v3 = vld [vmem:[%s3727_s0 + $0x2e0] sm:$0xff] }
  0x25   :  { %841 = vperm.xlu2 %2159, %v776_v1   ;;  %v785_v50 = vsel %vm753_vm3, 1, %v2259_v19  ;;  %v771_v52 = vsel %vm739_vm5, 1, %v2259_v19  ;;  %vm754_vm6 = vcmp.gt.f32.partialorder %v722_v57, 0.0  ;;  %v2160_v49 = vld [vmem:[%s3729_s2] ss:$0 sm:$0xff]  ;;  %vm952_vm5 = vcmask 523264  }
  0x26   :  { %2137 = vmatpush.msrb.mxu3 %v2330_v4  ;;  %v765_v4 = vsel %vm733_vm8, 1, %v2259_v19  ;;  %v786_v63 = vsel %vm754_vm6, 1, %v2259_v19 }
  0x27   :  { %808 = vperm.xlu0 %2157, %v765_v4   ;;  %v709_v4 = vld [vmem:[%s3728_s3 + $0x68] sm:$0xff] }
  0x28   :  { %2138 = vmatpush.msrb.mxu3 %v2344_v7  ;;  %v42_v7 = vld [vmem:[%s3727_s0 + $0x50] sm:$0xff]  ;;  %vm741_vm9 = vcmp.gt.f32.partialorder %v709_v4, 0.0 }
  0x29   :  { %280 = vmatmul.f32.gmra.mxu0 %v35_v51  ;;  %v782_v51 = vsel %vm750_vm4, 1, %v2259_v19  ;;  %v773_v12 = vsel %vm741_vm9, 1, %v2259_v19 }
  0x2a   :  { %393 = vmatmul.f32.gmra.mxu1 %v36_v53  ;;  %2139 = vmatpush.msrb.mxu3 %v2359_v10  ;;  %v122_v10 = vld [vmem:[%s3727_s0 + $0x2d0] sm:$0xff]  ;;  %v59_v53 = vld [vmem:[%s3727_s0 + $0xd8] sm:$0xff] }
  0x2b   :  { %2024 = vmatmul.msk.f32.gmra.mxu2 %vm164_vm0, %v46_v54  ;;  %361 = vmatmul.f32.gmra.mxu3 %v116_v55  ;;  %v60_v54 = vld [vmem:[%s3727_s0 + $0xe0] sm:$0xff]  ;;  %v70_v55 = vld [vmem:[%s3727_s0 + $0x130] sm:$0xff] }
  0x2c   :  { %2140 = vmatpush.msrb.mxu3 %v2378_v14  ;;  %v702_v14 = vld [vmem:[%s3728_s3 + $0x30] sm:$0xff] }
  0x2d   :  { %vm734_vm11 = vcmp.gt.f32.partialorder %v702_v14, 0.0  ;;  %844 = vperm.xlu2 %2159, %v777_v15   ;;  %v127_v14 = vld [vmem:[%s3727_s0 + $0x2f8] sm:$0xff]  ;;  %v710_v15 = vld [vmem:[%s3728_s3 + $0x70] sm:$0xff] }
  0x2e   :  { %2141 = vmatpush.msrb.mxu3 %v2388_v16  ;;  %v780_v16 = vsel %vm748_vm10, 1, %v2259_v19  ;;  %v766_v17 = vsel %vm734_vm11, 1, %v2259_v19  ;;  %vm742_vm11 = vcmp.gt.f32.partialorder %v710_v15, 0.0 }
  0x2f   :  { %853 = vperm.xlu1 %2158, %v780_v16   ;;  %811 = vperm.xlu0 %2157, %v766_v17   ;;  %v725_v16 = vld [vmem:[%s3728_s3 + $0xe8] sm:$0xff]  ;;  %v68_v17 = vld [vmem:[%s3727_s0 + $0x120] sm:$0xff] }
  0x30   :  { %2142 = vmatpush.msrb.mxu3 %v2397_v18  ;;  %v44_v18 = vld [vmem:[%s3727_s0 + $0x60] sm:$0xff]  ;;  %vm757_vm12 = vcmp.gt.f32.partialorder %v725_v16, 0.0 }
  0x31   :  { %283 = vmatmul.f32.gmra.mxu0 %v38_v58  ;;  %v705_v58 = vld [vmem:[%s3728_s3 + $0x48] sm:$0xff] }
  0x32   :  { %396 = vmatmul.f32.gmra.mxu1 %v39_v59  ;;  %2143 = vmatpush.msrb.mxu3 %v2407_v21  ;;  %v55_v21 = vld [vmem:[%s3727_s0 + $0xb8] sm:$0xff]  ;;  %v708_v59 = vld [vmem:[%s3728_s3 + $0x60] sm:$0xff]  ;;  %vm737_vm7 = vcmp.gt.f32.partialorder %v705_v58, 0.0 }
  0x33   :  { %2025 = vmatmul.msk.f32.gmra.mxu2 %vm164_vm0, %v49_v60  ;;  %364 = vmatmul.f32.gmra.mxu3 %v119_v61  ;;  %v62_v60 = vld [vmem:[%s3727_s0 + $0xf0] sm:$0xff]  ;;  %vm740_vm8 = vcmp.gt.f32.partialorder %v708_v59, 0.0  ;;  %v63_v61 = vld [vmem:[%s3727_s0 + $0xf8] sm:$0xff]  ;;  %v769_v0 = vsel %vm737_vm7, 1, %v2259_v19 }
  0x34   :  { %2144 = vmatpush.msrb.mxu3 %v2420_v24  ;;  %v703_v24 = vld [vmem:[%s3728_s3 + $0x38] sm:$0xff]  ;;  %v772_v1 = vsel %vm740_vm8, 1, %v2259_v19 }
  0x35   :  { %vm735_vm13 = vcmp.gt.f32.partialorder %v703_v24, 0.0  ;;  %805 = vperm.xlu2 %2159, %v764_v25   ;;  %v726_v24 = vld [vmem:[%s3728_s3 + $0xf0] sm:$0xff]  ;;  %v71_v25 = vld [vmem:[%s3727_s0 + $0x138] sm:$0xff] }
  0x36   :  { %2145 = vmatpush.msrb.mxu3 %v2434_v27  ;;  %v767_v26 = vsel %vm735_vm13, 1, %v2259_v19  ;;  %v47_v27 = vld [vmem:[%s3727_s0 + $0x78] sm:$0xff]  ;;  %vm759_vm13 = vcmp.gt.f32.partialorder %v727_v23, 0.0  ;;  %v89_v23 = vld [vmem:[%s3727_s0 + $0x1c8] sm:$0xff] }
  0x37   :  { %814 = vperm.xlu1 %2158, %v767_v26   ;;  %v72_v26 = vld [vmem:[%s3727_s0 + $0x140] sm:$0xff] }
  0x38   :  { %2146 = vmatpush.msrb.mxu3 %v2447_v31  ;;  %v50_v31 = vld [vmem:[%s3727_s0 + $0x90] sm:$0xff] }
  0x39   :  { %286 = vmatmul.f32.gmra.mxu0 %v41_v6  ;;  %v706_v6 = vld [vmem:[%s3728_s3 + $0x50] sm:$0xff] }
  0x3a   :  { %399 = vmatmul.f32.gmra.mxu1 %v42_v7  ;;  %2147 = vmatpush.msrb.mxu3 %v2456_v33  ;;  %v719_v33 = vld [vmem:[%s3728_s3 + $0xb8] sm:$0xff]  ;;  %v65_v7 = vld [vmem:[%s3727_s0 + $0x108] sm:$0xff]  ;;  %vm738_vm10 = vcmp.gt.f32.partialorder %v706_v6, 0.0 }
  0x3b   :  { %2026 = vmatmul.msk.f32.gmra.mxu2 %vm164_vm0, %v52_v9  ;;  %367 = vmatmul.f32.gmra.mxu3 %v122_v10  ;;  %vm751_vm15 = vcmp.gt.f32.partialorder %v719_v33, 0.0  ;;  %v66_v9 = vld [vmem:[%s3727_s0 + $0x110] sm:$0xff]  ;;  %v76_v10 = vld [vmem:[%s3727_s0 + $0x160] sm:$0xff]  ;;  %v770_v13 = vsel %vm738_vm10, 1, %v2259_v19  ;;  %v77_v33 = vld [vmem:[%s3727_s0 + $0x168] sm:$0xff]  ;;  %vm1149_vm10 = vcmask 1041409  }
  0x3c   :  { %2148 = vmatpush.msrb.mxu3 %v2468_v36  ;;  %v783_v34 = vsel %vm751_vm15, 1, %v2259_v19  ;;  %v54_v36 = vld [vmem:[%s3727_s0 + $0xb0] sm:$0xff] }
  0x3d   :  { %862 = vperm.xlu0 %2157, %v783_v34   ;;  %v78_v34 = vld [vmem:[%s3727_s0 + $0x170] sm:$0xff] }
  0x3e   :  { %2149 = vmatpush.msrb.mxu3 %v2479_v39  ;;  %v717_v39 = vld [vmem:[%s3728_s3 + $0xa8] sm:$0xff] }
  0x3f   :  { %vm749_vm1 = vcmp.gt.f32.partialorder %v717_v39, 0.0 }
  0x40   :  { %2150 = vmatpush.msrb.mxu3 %v2491_v42  ;;  %v781_v41 = vsel %vm749_vm1, 1, %v2259_v19  ;;  %v784_v42 = vsel %vm752_vm2, 1, %v2259_v19 }
  0x41   :  { %289 = vmatmul.f32.gmra.mxu0 %v44_v18  ;;  %856 = vperm.xlu2 %2159, %v781_v41   ;;  %v69_v18 = vld [vmem:[%s3727_s0 + $0x128] sm:$0xff] }
  0x42   :  { %402 = vmatmul.f32.gmra.mxu1 %v45_v20  ;;  %2151 = vmatpush.msrb.mxu3 %v2501_v45  ;;  %v67_v45 = vld [vmem:[%s3727_s0 + $0x118] sm:$0xff] }
  0x43   :  { %2027 = vmatmul.msk.f32.gmra.mxu2 %vm164_vm0, %v55_v21  ;;  %370 = vmatmul.f32.gmra.mxu3 %v125_v22  ;;  %v79_v20 = vld [vmem:[%s3727_s0 + $0x178] sm:$0xff]  ;;  %v774_v21 = vsel %vm742_vm11, 1, %v2259_v19  ;;  %v789_v22 = vsel %vm757_vm12, 1, %v2259_v19 }
  0x44   :  { %2152 = vmatpush.msra.mxu3 %v2321_v2  ;;  %v114_v2 = vld [vmem:[%s3727_s0 + $0x290] sm:$0xff] }
  0x45   :  { %865 = vperm.xlu0 %2157, %v784_v42  }
  0x46   :  { %2153 = vmatpush.msra.mxu3 %v2335_v5  ;;  %v768_v5 = vsel %vm736_vm14, 1, %v2259_v19  ;;  %vm758_vm14 = vcmp.gt.f32.partialorder %v726_v24, 0.0 }
  0x47   :  { %817 = vperm.xlu1 %2158, %v768_v5   ;;  %v75_v5 = vld [vmem:[%s3727_s0 + $0x158] sm:$0xff] }
  0x48   :  { %2154 = vmatpush.msra.mxu3 %v2350_v8  ;;  %v51_v8 = vld [vmem:[%s3727_s0 + $0x98] sm:$0xff] }
  0x49   :  { %292 = vmatmul.f32.gmra.mxu0 %v47_v27  ;;  %859 = vperm.xlu2 %2159, %v782_v51   ;;  %v82_v27 = vld [vmem:[%s3727_s0 + $0x190] sm:$0xff] }
  0x4a   :  { %405 = vmatmul.f32.gmra.mxu1 %v48_v28  ;;  %2155 = vmatpush.msra.mxu3 %v2365_v11  ;;  %v117_v11 = vld [vmem:[%s3727_s0 + $0x2a8] sm:$0xff]  ;;  %v791_v28 = vsel %vm759_vm13, 1, %v2259_v19  ;;  %vm1151_vm13 = vcmask 1042434  }
  0x4b   :  { %2028 = vmatmul.msk.f32.gmra.mxu2 %vm164_vm0, %v58_v29  ;;  %471 = vmatmul.f32.vlgmr.msrb.gmra.mxu3 %v114_v2  ;;  %v790_v29 = vsel %vm758_vm14, 1, %v2259_v19 }
  0x4d   :  { %826 = vperm.xlu0 %2157, %v771_v52   ;;  %v83_v52 = vld [vmem:[%s3727_s0 + $0x198] sm:$0xff] }
  0x4f   :  { %868 = vperm.xlu1 %2158, %v785_v50  }
  0x51   :  { %295 = vmatmul.f32.gmra.mxu0 %v50_v31  ;;  %820 = vperm.xlu2 %2159, %v769_v0   ;;  %v85_v31 = vld [vmem:[%s3727_s0 + $0x1a8] sm:$0xff] }
  0x52   :  { %408 = vmatmul.f32.gmra.mxu1 %v51_v8  ;;  %v723_v8 = vld [vmem:[%s3728_s3 + $0xd8] sm:$0xff] }
  0x53   :  { %2029 = vmatmul.msk.f32.gmra.mxu2 %vm164_vm0, %v61_v32  ;;  %474 = vmatmul.f32.gmra.mxu3 %v117_v11  ;;  %vm755_vm15 = vcmp.gt.f32.partialorder %v723_v8, 0.0 }
  0x54   :  { %v787_v32 = vsel %vm755_vm15, 1, %v2259_v19 }
  0x55   :  { %829 = vperm.xlu0 %2157, %v772_v1   ;;  %v86_v1 = vld [vmem:[%s3727_s0 + $0x1b0] sm:$0xff] }
  0x57   :  { %871 = vperm.xlu1 %2158, %v786_v63  }
  0x59   :  { %298 = vmatmul.f32.gmra.mxu0 %v53_v35  ;;  %823 = vperm.xlu2 %2159, %v770_v13   ;;  %v88_v35 = vld [vmem:[%s3727_s0 + $0x1c0] sm:$0xff] }
  0x5a   :  { %411 = vmatmul.f32.gmra.mxu1 %v54_v36  ;;  %v724_v36 = vld [vmem:[%s3728_s3 + $0xe0] sm:$0xff] }
  0x5b   :  { %2030 = vmatmul.msk.f32.gmra.mxu2 %vm164_vm0, %v64_v37  ;;  %477 = vmatmul.f32.gmra.mxu3 %v120_v38  ;;  %vm756_vm1 = vcmp.gt.f32.partialorder %v724_v36, 0.0 }
  0x5c   :  { %v788_v37 = vsel %vm756_vm1, 1, %v2259_v19  ;;  %vm1153_vm1 = vcmask 1043459  }
  0x5d   :  { %880 = vperm.xlu0 %2157, %v789_v22  }
  0x5f   :  { %832 = vperm.xlu1 %2158, %v773_v12  }
  0x61   :  { %301 = vmatmul.f32.gmra.mxu0 %v56_v43  ;;  %874 = vperm.xlu2 %2159, %v787_v32   ;;  %v81_v43 = vld [vmem:[%s3727_s0 + $0x188] sm:$0xff] }
  0x62   :  { %414 = vmatmul.f32.gmra.mxu1 %v57_v44  ;;  %v91_v44 = vld [vmem:[%s3727_s0 + $0x1d8] sm:$0xff] }
  0x63   :  { %2031 = vmatmul.msk.f32.gmra.mxu2 %vm164_vm0, %v67_v45  ;;  %480 = vmatmul.f32.gmra.mxu3 %v123_v46  ;;  %v711_v45 = vld [vmem:[%s3728_s3 + $0x78] sm:$0xff] }
  0x64   :  { %vm743_vm2 = vcmp.gt.f32.partialorder %v711_v45, 0.0 }
  0x65   :  { %883 = vperm.xlu0 %2157, %v790_v29   ;;  %v775_v47 = vsel %vm743_vm2, 1, %v2259_v19 }
  0x67   :  { %835 = vperm.xlu1 %2158, %v774_v21  }
  0x69   :  { %304 = vmatmul.f32.gmra.mxu0 %v59_v53  ;;  %877 = vperm.xlu2 %2159, %v788_v37  }
  0x6a   :  { %417 = vmatmul.f32.gmra.mxu1 %v60_v54  ;;  %v84_v54 = vld [vmem:[%s3727_s0 + $0x1a0] sm:$0xff] }
  0x6b   :  { %2032 = vmatmul.msk.f32.gmra.mxu2 %vm164_vm0, %v70_v55  ;;  %483 = vmatmul.f32.gmra.mxu3 %v126_v56  ;;  %v94_v55 = vld [vmem:[%s3727_s0 + $0x1f0] sm:$0xff] }
  0x6f   :  { %886 = vperm.xlu1 %2158, %v791_v28  }
  0x71   :  { %307 = vmatmul.f32.gmra.mxu0 %v62_v60  ;;  %838 = vperm.xlu2 %2159, %v775_v47  }
  0x72   :  { %420 = vmatmul.f32.gmra.mxu1 %v63_v61 }
  0x73   :  { %2033 = vmatmul.msk.f32.gmra.mxu2 %vm164_vm0, %v73_v62  ;;  %2050 = vmatmul.msk.f32.vlgmr.msra.gmra.mxu3 %vm164_vm0, %v124_v3 }
  0x79   :  { %310 = vmatmul.f32.gmra.mxu0 %v65_v7 }
  0x7a   :  { %423 = vmatmul.f32.gmra.mxu1 %v66_v9  ;;  %v87_v9 = vld [vmem:[%s3727_s0 + $0x1b8] sm:$0xff] }
  0x7b   :  { %2034 = vmatmul.msk.f32.gmra.mxu2 %vm164_vm0, %v76_v10  ;;  %2051 = vmatmul.msk.f32.gmra.mxu3 %vm164_vm0, %v127_v14  ;;  %v97_v10 = vld [vmem:[%s3727_s0 + $0x208] sm:$0xff]  ;;  %v2161_v14 = vld [vmem:[%s3729_s2 + $0x1] ss:$0 sm:$0xff] }
  0x7f   :  { %v794_v41 = vpop.permute.xlu0 %793  ;;  %v2877_v16 = vpop.permute.xlu2 %841 }
  0x80   :  { %vm888_vm3 = vcmp.eq.s32.totalorder %v794_v41, 1 }
  0x81   :  { %313 = vmatmul.f32.gmra.mxu0 %v68_v17 }
  0x82   :  { %426 = vmatmul.f32.gmra.mxu1 %v69_v18 }
  0x83   :  { %2035 = vmatmul.msk.f32.gmra.mxu2 %vm164_vm0, %v79_v20  ;;  %v800_v3 = vpop.permute.xlu1 %799 }
  0x84   :  { %vm890_vm6 = vcmp.eq.s32.totalorder %v800_v3, 1 }
  0x87   :  { %v797_v58 = vpop.permute.xlu0 %796 }
  0x88   :  { %vm889_vm4 = vcmp.eq.s32.totalorder %v797_v58, 1 }
  0x89   :  { %316 = vmatmul.f32.gmra.mxu0 %v71_v25  ;;  %v90_v25 = vld [vmem:[%s3727_s0 + $0x1d0] sm:$0xff] }
  0x8a   :  { %429 = vmatmul.f32.gmra.mxu1 %v72_v26  ;;  %v100_v26 = vld [vmem:[%s3727_s0 + $0x220] sm:$0xff] }
  0x8b   :  { %2036 = vmatmul.msk.f32.gmra.mxu2 %vm164_vm0, %v82_v27  ;;  %v803_v28 = vpop.permute.xlu1 %802 }
  0x8c   :  { %vm891_vm7 = vcmp.eq.s32.totalorder %v803_v28, 1 }
  0x8e   :  { %v504_v2 = vpop.f32.mrf.mxu2 }
  0x91   :  { %319 = vmatmul.f32.gmra.mxu0 %v74_v30  ;;  %v2889_v30 = vpop.permute.xlu2 %844 }
  0x92   :  { %432 = vmatmul.f32.gmra.mxu1 %v75_v5 }
  0x93   :  { %2037 = vmatmul.msk.f32.gmra.mxu2 %vm164_vm0, %v85_v31 }
  0x96   :  { %v507_v11 = vpop.f32.mrf.mxu2  ;;  %v2908_v47 = vpop.permute.xlu1 %850 }
  0x99   :  { %322 = vmatmul.f32.gmra.mxu0 %v77_v33  ;;  %v92_v33 = vld [vmem:[%s3727_s0 + $0x1e0] sm:$0xff] }
  0x9a   :  { %435 = vmatmul.f32.gmra.mxu1 %v78_v34  ;;  %v2894_v34 = vpop.permute.xlu0 %847 }
  0x9b   :  { %2038 = vmatmul.msk.f32.gmra.mxu2 %vm164_vm0, %v88_v35 }
  0x9e   :  { %v510_v38 = vpop.f32.mrf.mxu2  ;;  %v278_v39 = vpop.f32.mrf.mxu0 }
  0x9f   :  { %v391_v42 = vpop.f32.mrf.mxu1 }
  0xa0   :  { %v392_v46 = vadd.f32 %v391_v42, %v278_v39  ;;  %v103_v39 = vld [vmem:[%s3727_s0 + $0x238] sm:$0xff] }
  0xa1   :  { %325 = vmatmul.f32.gmra.mxu0 %v80_v40 }
  0xa2   :  { %438 = vmatmul.f32.gmra.mxu1 %v81_v43  ;;  %v505_v48 = vadd.f32 %v504_v2, %v392_v46  ;;  %v2162_v46 = vld [vmem:[%s3729_s2 + $0x2] ss:$0 sm:$0xff] }
  0xa3   :  { %2039 = vmatmul.msk.f32.gmra.mxu2 %vm164_vm0, %v91_v44 }
  0xa4   :  { %v664_v56 = vadd.f32 %v2160_v49, %v505_v48 }
  0xa6   :  { %v513_v50 = vpop.f32.mrf.mxu2  ;;  %v281_v51 = vpop.f32.mrf.mxu0  ;;  %v920_v60 = vsel %vm888_vm3, %v664_v56, -1e+30  ;;  %v106_v56 = vld [vmem:[%s3727_s0 + $0x250] sm:$0xff] }
  0xa7   :  { %v394_v53 = vpop.f32.mrf.mxu1  ;;  %v953_v4 = vsel %vm952_vm5, %v920_v60, -inf  ;;  %v809_v60 = vpop.permute.xlu0 %808 }
  0xa8   :  { %v395_v57 = vadd.f32 %v394_v53, %v281_v51  ;;  %v806_v51 = vpop.permute.xlu2 %805  ;;  %v95_v53 = vld [vmem:[%s3727_s0 + $0x1f8] sm:$0xff]  ;;  %vm893_vm9 = vcmp.eq.s32.totalorder %v809_v60, 1 }
  0xa9   :  { %328 = vmatmul.f32.gmra.mxu0 %v83_v52  ;;  %vm892_vm8 = vcmp.eq.s32.totalorder %v806_v51, 1 }
  0xaa   :  { %v508_v59 = vadd.f32 %v507_v11, %v395_v57  ;;  %441 = vmatmul.f32.gmra.mxu1 %v84_v54 }
  0xab   :  { %2040 = vmatmul.msk.f32.gmra.mxu2 %vm164_vm0, %v94_v55  ;;  %v96_v55 = vld [vmem:[%s3727_s0 + $0x200] sm:$0xff] }
  0xac   :  { %v665_v61 = vadd.f32 %v2160_v49, %v508_v59 }
  0xae   :  { %v516_v62 = vpop.f32.mrf.mxu2  ;;  %v921_v63 = vsel %vm889_vm4, %v665_v61, -1e+30  ;;  %v284_v0 = vpop.f32.mrf.mxu0 }
  0xaf   :  { %v954_v6 = vsel %vm952_vm5, %v921_v63, -inf  ;;  %v397_v7 = vpop.f32.mrf.mxu1 }
  0xb0   :  { %v955_v12 = vmax.f32 %v953_v4, %v954_v6  ;;  %v398_v13 = vadd.f32 %v397_v7, %v284_v0 }
  0xb1   :  { %331 = vmatmul.f32.gmra.mxu0 %v86_v1 }
  0xb2   :  { %v511_v15 = vadd.f32 %v510_v38, %v398_v13  ;;  %444 = vmatmul.f32.gmra.mxu1 %v87_v9  ;;  %v956_v18 = vrot.slane %v955_v12, 4  ;;  %v93_v38 = vld [vmem:[%s3727_s0 + $0x1e8] sm:$0xff]  ;;  %v98_v9 = vld [vmem:[%s3727_s0 + $0x210] sm:$0xff] }
  0xb3   :  { %2041 = vmatmul.msk.f32.gmra.mxu2 %vm164_vm0, %v97_v10  ;;  %v2927_v10 = vpop.permute.xlu1 %853 }
  0xb4   :  { %v666_v17 = vadd.f32 %v2161_v14, %v511_v15  ;;  %v957_v29 = vmax.f32 %v955_v12, %v956_v18  ;;  %v99_v15 = vld [vmem:[%s3727_s0 + $0x218] sm:$0xff] }
  0xb6   :  { %v519_v20 = vpop.f32.mrf.mxu2  ;;  %v922_v21 = vsel %vm890_vm6, %v666_v17, -1e+30  ;;  %v287_v22 = vpop.f32.mrf.mxu0  ;;  %v958_v31 = vrot.slane %v957_v29, 2  ;;  %v109_v17 = vld [vmem:[%s3727_s0 + $0x268] sm:$0xff] }
  0xb7   :  { %v400_v24 = vpop.f32.mrf.mxu1  ;;  %v962_v35 = vsel %vm952_vm5, %v922_v21, -inf }
  0xb8   :  { %v401_v27 = vadd.f32 %v400_v24, %v287_v22  ;;  %v959_v42 = vmax.f32 %v957_v29, %v958_v31 }
  0xb9   :  { %334 = vmatmul.f32.gmra.mxu0 %v89_v23 }
  0xba   :  { %v514_v2 = vadd.f32 %v513_v50, %v401_v27  ;;  %447 = vmatmul.f32.gmra.mxu1 %v90_v25  ;;  %v960_v48 = vrot.slane %v959_v42, 1  ;;  %v2941_v27 = vpop.permute.xlu2 %856 }
  0xbb   :  { %2042 = vmatmul.msk.f32.gmra.mxu2 %vm164_vm0, %v100_v26  ;;  %v2163_v26 = vld [vmem:[%s3729_s2 + $0x3] ss:$0 sm:$0xff] }
  0xbc   :  { %v667_v5 = vadd.f32 %v2161_v14, %v514_v2  ;;  %v961_v61 = vmax.f32 %v959_v42, %v960_v48  ;;  %v104_v48 = vld [vmem:[%s3727_s0 + $0x240] sm:$0xff] }
  0xbe   :  { %v522_v8 = vpop.f32.mrf.mxu2  ;;  %v923_v32 = vsel %vm891_vm7, %v667_v5, -1e+30  ;;  %v290_v11 = vpop.f32.mrf.mxu0  ;;  %2179 = vtanh.f32 %v961_v61  ;;  %v2164_v61 = vld [vmem:[%s3729_s2 + $0x4] ss:$0 sm:$0xff] }
  0xbf   :  { %v963_v36 = vsel %vm952_vm5, %v923_v32, -inf  ;;  %v403_v37 = vpop.f32.mrf.mxu1  ;;  %v812_v5 = vpop.permute.xlu0 %811 }
  0xc0   :  { %v964_v40 = vmax.f32 %v962_v35, %v963_v36  ;;  %v404_v41 = vadd.f32 %v403_v37, %v290_v11  ;;  %v102_v11 = vld [vmem:[%s3727_s0 + $0x230] sm:$0xff]  ;;  %vm894_vm11 = vcmp.eq.s32.totalorder %v812_v5, 1 }
  0xc1   :  { %337 = vmatmul.f32.gmra.mxu0 %v92_v33  ;;  %v112_v33 = vld [vmem:[%s3727_s0 + $0x280] sm:$0xff] }
  0xc2   :  { %v965_v43 = vrot.slane %v964_v40, 4  ;;  %v517_v44 = vadd.f32 %v516_v62, %v404_v41  ;;  %450 = vmatmul.f32.gmra.mxu1 %v93_v38  ;;  %v815_v38 = vpop.permute.xlu1 %814 }
  0xc3   :  { %2043 = vmatmul.msk.f32.gmra.mxu2 %vm164_vm0, %v103_v39  ;;  %vm895_vm12 = vcmp.eq.s32.totalorder %v815_v38, 1 }
  0xc4   :  { %v966_v45 = vmax.f32 %v964_v40, %v965_v43  ;;  %v668_v58 = vadd.f32 %v2162_v46, %v517_v44  ;;  %v2180_v23 = vpop.eup %2179 }
  0xc6   :  { %v2910_v49 = vpop.f32.mrf.mxu2  ;;  %v967_v50 = vrot.slane %v966_v45, 2  ;;  %v293_v52 = vpop.f32.mrf.mxu0  ;;  %v924_v1 = vsel %vm892_vm8, %v668_v58, -1e+30 }
  0xc7   :  { %v406_v54 = vpop.f32.mrf.mxu1  ;;  %v971_v12 = vsel %vm952_vm5, %v924_v1, -inf }
  0xc8   :  { %v968_v57 = vmax.f32 %v966_v45, %v967_v50  ;;  %v407_v59 = vadd.f32 %v406_v54, %v293_v52  ;;  %v2960_v50 = vpop.permute.xlu2 %859  ;;  %v115_v54 = vld [vmem:[%s3727_s0 + $0x298] sm:$0xff] }
  0xc9   :  { %340 = vmatmul.f32.gmra.mxu0 %v95_v53  ;;  %v105_v53 = vld [vmem:[%s3727_s0 + $0x248] sm:$0xff] }
  0xca   :  { %v969_v62 = vrot.slane %v968_v57, 1  ;;  %v520_v63 = vadd.f32 %v519_v20, %v407_v59  ;;  %453 = vmatmul.f32.gmra.mxu1 %v96_v55  ;;  %v818_v1 = vpop.permute.xlu1 %817 }
  0xcb   :  { %2044 = vmatmul.msk.f32.gmra.mxu2 %vm164_vm0, %v106_v56  ;;  %vm896_vm14 = vcmp.eq.s32.totalorder %v818_v1, 1 }
  0xcc   :  { %v970_v0 = vmax.f32 %v968_v57, %v969_v62  ;;  %v669_v3 = vadd.f32 %v2162_v46, %v520_v63 }
  0xce   :  { %v2922_v4 = vpop.f32.mrf.mxu2  ;;  %2181 = vtanh.f32 %v970_v0  ;;  %v925_v6 = vsel %vm893_vm9, %v669_v3, -1e+30  ;;  %v296_v7 = vpop.f32.mrf.mxu0  ;;  %vm904_vm9 = vcmp.eq.s32.totalorder %v2877_v16, 1 }
  0xcf   :  { %v972_v13 = vsel %vm952_vm5, %v925_v6, -inf  ;;  %v409_v14 = vpop.f32.mrf.mxu1  ;;  %v107_v6 = vld [vmem:[%s3727_s0 + $0x258] sm:$0xff] }
  0xd0   :  { %v973_v18 = vmax.f32 %v971_v12, %v972_v13  ;;  %v410_v20 = vadd.f32 %v409_v14, %v296_v7 }
  0xd1   :  { %343 = vmatmul.f32.gmra.mxu0 %v98_v9  ;;  %v108_v9 = vld [vmem:[%s3727_s0 + $0x260] sm:$0xff] }
  0xd2   :  { %v974_v21 = vrot.slane %v973_v18, 4  ;;  %v523_v22 = vadd.f32 %v522_v8, %v410_v20  ;;  %456 = vmatmul.f32.gmra.mxu1 %v99_v15  ;;  %v101_v8 = vld [vmem:[%s3727_s0 + $0x228] sm:$0xff]  ;;  %v821_v15 = vpop.permute.xlu2 %820 }
  0xd3   :  { %2045 = vmatmul.msk.f32.gmra.mxu2 %vm164_vm0, %v109_v17  ;;  %v2985_v17 = vpop.permute.xlu0 %862  ;;  %vm897_vm15 = vcmp.eq.s32.totalorder %v821_v15, 1 }
  0xd4   :  { %v2182_v24 = vpop.eup %2181  ;;  %v975_v25 = vmax.f32 %v973_v18, %v974_v21  ;;  %v670_v36 = vadd.f32 %v2163_v26, %v523_v22 }
  0xd5   :  { %v1150_v28 = vsel %vm1149_vm10, %v2182_v24, %v2180_v23 }
  0xd6   :  { %v531_v29 = vpop.f32.mrf.mxu2  ;;  %v976_v2 = vrot.slane %v975_v25, 2  ;;  %v299_v31 = vpop.f32.mrf.mxu0  ;;  %v926_v42 = vsel %vm894_vm11, %v670_v36, -1e+30  ;;  %vm905_vm11 = vcmp.eq.s32.totalorder %v2889_v30, 1 }
  0xd7   :  { %v412_v32 = vpop.f32.mrf.mxu1 }
  0xd8   :  { %v977_v35 = vmax.f32 %v975_v25, %v976_v2  ;;  %v413_v37 = vadd.f32 %v412_v32, %v299_v31  ;;  %v2991_v2 = vpop.f32.mrf.mxu3  ;;  %v121_v32 = vld [vmem:[%s3727_s0 + $0x2c8] sm:$0xff] }
  0xd9   :  { %346 = vmatmul.f32.gmra.mxu0 %v101_v8  ;;  %v111_v8 = vld [vmem:[%s3727_s0 + $0x278] sm:$0xff] }
  0xda   :  { %v978_v39 = vrot.slane %v977_v35, 1  ;;  %v526_v40 = vadd.f32 %v2910_v49, %v413_v37  ;;  %459 = vmatmul.f32.gmra.mxu1 %v102_v11  ;;  %v980_v49 = vsel %vm952_vm5, %v926_v42, -inf  ;;  %v3005_v42 = vpop.permute.xlu1 %868 }
  0xdb   :  { %2046 = vmatmul.msk.f32.gmra.mxu2 %vm164_vm0, %v112_v33 }
  0xdc   :  { %v979_v41 = vmax.f32 %v977_v35, %v978_v39  ;;  %v671_v43 = vadd.f32 %v2163_v26, %v526_v40  ;;  %v3002_v35 = vpop.permute.xlu0 %865 }
  0xde   :  { %v2955_v44 = vpop.f32.mrf.mxu2  ;;  %2183 = vtanh.f32 %v979_v41  ;;  %v927_v45 = vsel %vm895_vm12, %v671_v43, -1e+30  ;;  %v302_v46 = vpop.f32.mrf.mxu0  ;;  %vm1157_vm12 = vcmask 1045509  }
  0xdf   :  { %v981_v51 = vsel %vm952_vm5, %v927_v45, -inf  ;;  %v415_v52 = vpop.f32.mrf.mxu1 }
  0xe0   :  { %v982_v55 = vmax.f32 %v980_v49, %v981_v51  ;;  %v416_v56 = vadd.f32 %v415_v52, %v302_v46  ;;  %v3007_v46 = vpop.f32.mrf.mxu3  ;;  %v824_v51 = vpop.permute.xlu2 %823 }
  0xe1   :  { %349 = vmatmul.f32.gmra.mxu0 %v104_v48  ;;  %vm898_vm3 = vcmp.eq.s32.totalorder %v824_v51, 1 }
  0xe2   :  { %v983_v57 = vrot.slane %v982_v55, 4  ;;  %462 = vmatmul.f32.gmra.mxu1 %v105_v53  ;;  %v529_v60 = vadd.f32 %v2922_v4, %v416_v56  ;;  %v118_v4 = vld [vmem:[%s3727_s0 + $0x2b0] sm:$0xff] }
  0xe3   :  { %2047 = vmatmul.msk.f32.gmra.mxu2 %vm164_vm0, %v115_v54 }
  0xe4   :  { %v2184_v58 = vpop.eup %2183  ;;  %v984_v59 = vmax.f32 %v982_v55, %v983_v57  ;;  %v672_v13 = vadd.f32 %v2164_v61, %v529_v60  ;;  %v827_v53 = vpop.permute.xlu0 %826 }
  0xe5   :  { %v1152_v62 = vsel %vm1151_vm13, %v2184_v58, %v1150_v28  ;;  %v110_v28 = vld [vmem:[%s3727_s0 + $0x270] sm:$0xff]  ;;  %v3009_v60 = vpop.permute.xlu1 %871  ;;  %vm899_vm2 = vcmp.eq.s32.totalorder %v827_v53, 1 }
  0xe6   :  { %v537_v63 = vpop.f32.mrf.mxu2  ;;  %v985_v0 = vrot.slane %v984_v59, 2  ;;  %v305_v3 = vpop.f32.mrf.mxu0  ;;  %v928_v22 = vsel %vm896_vm14, %v672_v13, -1e+30  ;;  %vm1159_vm14 = vcmask 1046534  }
  0xe7   :  { %v418_v7 = vpop.f32.mrf.mxu1  ;;  %v989_v5 = vsel %vm952_vm5, %v928_v22, -inf }
  0xe8   :  { %v986_v12 = vmax.f32 %v984_v59, %v985_v0  ;;  %v419_v14 = vadd.f32 %v418_v7, %v305_v3  ;;  %v3015_v0 = vpop.f32.mrf.mxu3  ;;  %v2166_v7 = vld [vmem:[%s3729_s2 + $0x6] ss:$0 sm:$0xff] }
  0xe9   :  { %352 = vmatmul.f32.gmra.mxu0 %v107_v6 }
  0xea   :  { %v987_v18 = vrot.slane %v986_v12, 1  ;;  %v532_v20 = vadd.f32 %v531_v29, %v419_v14  ;;  %465 = vmatmul.f32.gmra.mxu1 %v108_v9 }
  0xeb   :  { %2048 = vmatmul.msk.f32.gmra.mxu2 %vm164_vm0, %v118_v4 }
  0xec   :  { %v988_v21 = vmax.f32 %v986_v12, %v987_v18  ;;  %v673_v23 = vadd.f32 %v2164_v61, %v532_v20  ;;  %v830_v12 = vpop.permute.xlu0 %829 }
  0xed   :  { %vm900_vm4 = vcmp.eq.s32.totalorder %v830_v12, 1 }
  0xee   :  { %v540_v24 = vpop.f32.mrf.mxu2  ;;  %2185 = vtanh.f32 %v988_v21  ;;  %v929_v25 = vsel %vm897_vm15, %v673_v23, -1e+30  ;;  %v308_v26 = vpop.f32.mrf.mxu0  ;;  %vm1161_vm15 = vcmask 1047559  }
  0xef   :  { %v990_v29 = vsel %vm952_vm5, %v929_v25, -inf  ;;  %v421_v31 = vpop.f32.mrf.mxu1  ;;  %v833_v23 = vpop.permute.xlu1 %832 }
  0xf0   :  { %v991_v11 = vmax.f32 %v989_v5, %v990_v29  ;;  %v422_v55 = vadd.f32 %v421_v31, %v308_v26  ;;  %vm901_vm6 = vcmp.eq.s32.totalorder %v833_v23, 1 }
  0xf1   :  { %355 = vmatmul.f32.gmra.mxu0 %v110_v28  ;;  %v3026_v28 = vpop.f32.mrf.mxu3 }
  0xf2   :  { %v992_v33 = vrot.slane %v991_v11, 4  ;;  %468 = vmatmul.f32.gmra.mxu1 %v111_v8  ;;  %v535_v61 = vadd.f32 %v2955_v44, %v422_v55 }
  0xf3   :  { %2049 = vmatmul.msk.f32.gmra.mxu2 %vm164_vm0, %v121_v32  ;;  %vm1155_vm0 = vcmask 1044484  }
  0xf4   :  { %v2186_v36 = vpop.eup %2185  ;;  %v993_v37 = vmax.f32 %v991_v11, %v992_v33 }
  0xf5   :  { %v1154_v38 = vsel %vm1153_vm1, %v2186_v36, %v1152_v62  ;;  %v2165_v62 = vld [vmem:[%s3729_s2 + $0x5] ss:$0 sm:$0xff] }
  0xf6   :  { %v543_v39 = vpop.f32.mrf.mxu2  ;;  %v994_v40 = vrot.slane %v993_v37, 2  ;;  %v311_v41 = vpop.f32.mrf.mxu0  ;;  %v674_v4 = vadd.f32 %v2165_v62, %v535_v61 }
  0xf7   :  { %v424_v43 = vpop.f32.mrf.mxu1 }
  0xf8   :  { %v995_v45 = vmax.f32 %v993_v37, %v994_v40  ;;  %v425_v52 = vadd.f32 %v424_v43, %v311_v41  ;;  %v930_v21 = vsel %vm898_vm3, %v674_v4, -1e+30  ;;  %vm907_vm3 = vcmp.eq.s32.totalorder %v2908_v47, 1 }
  0xf9   :  { %v998_v5 = vsel %vm952_vm5, %v930_v21, -inf }
  0xfa   :  { %v996_v48 = vrot.slane %v995_v45, 1  ;;  %v538_v58 = vadd.f32 %v537_v63, %v425_v52  ;;  %v3020_v63 = vpop.permute.xlu2 %874  ;;  %v3036_v52 = vpop.f32.mrf.mxu3 }
  0xfc   :  { %v997_v49 = vmax.f32 %v995_v45, %v996_v48  ;;  %v675_v3 = vadd.f32 %v2165_v62, %v538_v58  ;;  %v2168_v45 = vld [vmem:[%s3729_s2 + $0x7] ss:$0 sm:$0xff] }
  0xfe   :  { %v546_v54 = vpop.f32.mrf.mxu2  ;;  %2187 = vtanh.f32 %v997_v49  ;;  %v314_v56 = vpop.f32.mrf.mxu0  ;;  %v931_v15 = vsel %vm899_vm2, %v675_v3, -1e+30  ;;  %vm906_vm2 = vcmp.eq.s32.totalorder %v2894_v34, 1 }
  0xff   :  { %v427_v57 = vpop.f32.mrf.mxu1 }
 0x100   :  { %v428_v59 = vadd.f32 %v427_v57, %v314_v56  ;;  %v836_v56 = vpop.permute.xlu1 %835 }
 0x101   :  { %vm902_vm7 = vcmp.eq.s32.totalorder %v836_v56, 1 }
 0x102   :  { %v541_v6 = vadd.f32 %v540_v24, %v428_v59  ;;  %v999_v24 = vsel %vm952_vm5, %v931_v15, -inf  ;;  %v3029_v11 = vpop.permute.xlu2 %877 }
 0x103   :  { %v1000_v31 = vmax.f32 %v998_v5, %v999_v24 }
 0x104   :  { %v2188_v1 = vpop.eup %2187  ;;  %v676_v18 = vadd.f32 %v2166_v7, %v541_v6 }
 0x105   :  { %v3023_v9 = vsel %vm1155_vm0, %v2188_v1, %v1154_v38  ;;  %v1001_v40 = vrot.slane %v1000_v31, 4 }
 0x106   :  { %v549_v44 = vpop.f32.mrf.mxu2  ;;  %v317_v13 = vpop.f32.mrf.mxu0  ;;  %v932_v25 = vsel %vm900_vm4, %v676_v18, -1e+30  ;;  %vm908_vm4 = vcmp.eq.s32.totalorder %v2927_v10, 1 }
 0x107   :  { %v430_v14 = vpop.f32.mrf.mxu1  ;;  %v1007_v33 = vsel %vm952_vm5, %v932_v25, -inf  ;;  %v1002_v49 = vmax.f32 %v1000_v31, %v1001_v40 }
 0x108   :  { %v431_v20 = vadd.f32 %v430_v14, %v317_v13 }
 0x109   :  { %v1003_v61 = vrot.slane %v1002_v49, 2 }
 0x10a   :  { %v544_v22 = vadd.f32 %v543_v39, %v431_v20  ;;  %v839_v59 = vpop.permute.xlu2 %838 }
 0x10b   :  { %vm903_vm8 = vcmp.eq.s32.totalorder %v839_v59, 1 }
 0x10c   :  { %v677_v26 = vadd.f32 %v2166_v7, %v544_v22  ;;  %v1004_v7 = vmax.f32 %v1002_v49, %v1003_v61  ;;  %v3043_v22 = vpop.f32.mrf.mxu3 }
 0x10e   :  { %v552_v29 = vpop.f32.mrf.mxu2  ;;  %v933_v8 = vsel %vm901_vm6, %v677_v26, -1e+30  ;;  %v320_v32 = vpop.f32.mrf.mxu0  ;;  %v1005_v23 = vrot.slane %v1004_v7, 1  ;;  %vm909_vm6 = vcmp.eq.s32.totalorder %v2941_v27, 1  ;;  %v2172_v27 = vld [vmem:[%s3729_s2 + $0xb] ss:$0 sm:$0xff] }
 0x10f   :  { %v1008_v36 = vsel %vm952_vm5, %v933_v8, -inf  ;;  %v433_v37 = vpop.f32.mrf.mxu1 }
 0x110   :  { %v1009_v38 = vmax.f32 %v1007_v33, %v1008_v36  ;;  %v434_v39 = vadd.f32 %v433_v37, %v320_v32  ;;  %v1006_v32 = vmax.f32 %v1004_v7, %v1005_v23  ;;  %v1118_v7 = vld [vmem:[%s3730_s4 + $0x10] sm:$0xff] }
 0x112   :  { %v1010_v41 = vrot.slane %v1009_v38, 4  ;;  %v547_v43 = vadd.f32 %v546_v54, %v434_v39  ;;  %2189 = vtanh.f32 %v1006_v32 }
 0x114   :  { %v1011_v53 = vmax.f32 %v1009_v38, %v1010_v41  ;;  %v678_v57 = vadd.f32 %v2168_v45, %v547_v43  ;;  %v3046_v49 = vpop.f32.mrf.mxu3 }
 0x116   :  { %v555_v48 = vpop.f32.mrf.mxu2  ;;  %v323_v51 = vpop.f32.mrf.mxu0  ;;  %v1012_v1 = vrot.slane %v1011_v53, 2  ;;  %v934_v54 = vsel %vm902_vm7, %v678_v57, -1e+30  ;;  %vm910_vm7 = vcmp.eq.s32.totalorder %v2960_v50, 1  ;;  %v2167_v50 = vld [vmem:[%s3729_s2 + $0xf] ss:$0 sm:$0xff] }
 0x117   :  { %v436_v55 = vpop.f32.mrf.mxu1  ;;  %v1016_v14 = vsel %vm952_vm5, %v934_v54, -inf }
 0x118   :  { %v437_v58 = vadd.f32 %v436_v55, %v323_v51  ;;  %v1013_v13 = vmax.f32 %v1011_v53, %v1012_v1  ;;  %v2190_v59 = vpop.eup %2189 }
 0x119   :  { %v1158_v54 = vsel %vm1157_vm12, %v2190_v59, %v3023_v9 }
 0x11a   :  { %v550_v62 = vadd.f32 %v549_v44, %v437_v58  ;;  %v2169_v44 = vld [vmem:[%s3729_s2 + $0x8] ss:$0 sm:$0xff]  ;;  %v1014_v26 = vrot.slane %v1013_v13, 1 }
 0x11c   :  { %v679_v3 = vadd.f32 %v2168_v45, %v550_v62  ;;  %v1015_v38 = vmax.f32 %v1013_v13, %v1014_v26  ;;  %v2170_v62 = vld [vmem:[%s3729_s2 + $0x9] ss:$0 sm:$0xff] }
 0x11e   :  { %v558_v6 = vpop.f32.mrf.mxu2  ;;  %v935_v4 = vsel %vm903_vm8, %v679_v3, -1e+30  ;;  %v326_v12 = vpop.f32.mrf.mxu0  ;;  %2191 = vtanh.f32 %v1015_v38  ;;  %v1124_v3 = vld [vmem:[%s3730_s4 + $0x40] sm:$0xff]  ;;  %vm911_vm8 = vcmp.eq.s32.totalorder %v2985_v17, 1 }
 0x11f   :  { %v1017_v15 = vsel %vm952_vm5, %v935_v4, -inf  ;;  %v439_v18 = vpop.f32.mrf.mxu1 }
 0x120   :  { %v1018_v20 = vmax.f32 %v1016_v14, %v1017_v15  ;;  %v440_v21 = vadd.f32 %v439_v18, %v326_v12  ;;  %v1116_v14 = vld [vmem:[%s3730_s4] sm:$0xff]  ;;  %v3072_v18 = vpop.f32.mrf.mxu3 }
 0x122   :  { %v1019_v24 = vrot.slane %v1018_v20, 4  ;;  %v553_v25 = vadd.f32 %v552_v29, %v440_v21 }
 0x124   :  { %v1020_v5 = vmax.f32 %v1018_v20, %v1019_v24  ;;  %v680_v31 = vadd.f32 %v2169_v44, %v553_v25  ;;  %v2192_v1 = vpop.eup %2191 }
 0x125   :  { %v1160_v12 = vsel %vm1159_vm14, %v2192_v1, %v1158_v54 }
 0x126   :  { %v561_v8 = vpop.f32.mrf.mxu2  ;;  %v1021_v33 = vrot.slane %v1020_v5, 2  ;;  %v936_v36 = vsel %vm904_vm9, %v680_v31, -1e+30  ;;  %v329_v37 = vpop.f32.mrf.mxu0 }
 0x127   :  { %v442_v39 = vpop.f32.mrf.mxu1  ;;  %v1025_v56 = vsel %vm952_vm5, %v936_v36, -inf }
 0x128   :  { %v1022_v40 = vmax.f32 %v1020_v5, %v1021_v33  ;;  %v443_v41 = vadd.f32 %v442_v39, %v329_v37  ;;  %v1122_v33 = vld [vmem:[%s3730_s4 + $0x30] sm:$0xff]  ;;  %v1120_v37 = vld [vmem:[%s3730_s4 + $0x20] sm:$0xff] }
 0x12a   :  { %v1023_v43 = vrot.slane %v1022_v40, 1  ;;  %v556_v45 = vadd.f32 %v555_v48, %v443_v41 }
 0x12c   :  { %v1024_v29 = vmax.f32 %v1022_v40, %v1023_v43  ;;  %v681_v51 = vadd.f32 %v2169_v44, %v556_v45 }
 0x12e   :  { %v3049_v16 = vpop.f32.mrf.mxu2  ;;  %2193 = vtanh.f32 %v1024_v29  ;;  %v937_v53 = vsel %vm905_vm11, %v681_v51, -1e+30  ;;  %v332_v55 = vpop.f32.mrf.mxu0 }
 0x12f   :  { %v1026_v57 = vsel %vm952_vm5, %v937_v53, -inf  ;;  %v445_v58 = vpop.f32.mrf.mxu1 }
 0x130   :  { %v1027_v48 = vmax.f32 %v1025_v56, %v1026_v57  ;;  %v446_v61 = vadd.f32 %v445_v58, %v332_v55  ;;  %v3091_v55 = vpop.f32.mrf.mxu3  ;;  %v2171_v58 = vld [vmem:[%s3729_s2 + $0xa] ss:$0 sm:$0xff] }
 0x132   :  { %v559_v30 = vadd.f32 %v558_v6, %v446_v61  ;;  %v1028_v6 = vrot.slane %v1027_v48, 4  ;;  %v1128_v61 = vld [vmem:[%s3730_s4 + $0x60] sm:$0xff] }
 0x134   :  { %v2194_v4 = vpop.eup %2193  ;;  %v682_v13 = vadd.f32 %v2170_v62, %v559_v30  ;;  %v1029_v31 = vmax.f32 %v1027_v48, %v1028_v6  ;;  %v1126_v30 = vld [vmem:[%s3730_s4 + $0x50] sm:$0xff] }
 0x135   :  { %v3070_v9 = vsel %vm1161_vm15, %v2194_v4, %v1160_v12 }
 0x136   :  { %v567_v15 = vpop.f32.mrf.mxu2  ;;  %v938_v20 = vsel %vm906_vm2, %v682_v13, -1e+30  ;;  %v335_v21 = vpop.f32.mrf.mxu0  ;;  %v1180_v44 = vmul.f32 %v3070_v9, %v1124_v3  ;;  %v1174_v23 = vmul.f32 %v3070_v9, %v1118_v7  ;;  %v1172_v25 = vmul.f32 %v3070_v9, %v1116_v14 }
 0x137   :  { %v448_v24 = vpop.f32.mrf.mxu1  ;;  %v1178_v39 = vmul.f32 %v3070_v9, %v1122_v33  ;;  %v1030_v40 = vrot.slane %v1029_v31, 2  ;;  %v1176_v43 = vmul.f32 %v3070_v9, %v1120_v37  ;;  %v1034_v51 = vsel %vm952_vm5, %v938_v20, -inf }
 0x138   :  { %v449_v26 = vadd.f32 %v448_v24, %v335_v21  ;;  %v1212_v5 = vsel %vm952_vm5, %v1180_v44, 0.0  ;;  %v1194_v34 = vsel %vm952_vm5, %v1174_v23, 0.0  ;;  %v1188_v32 = vsel %vm952_vm5, %v1172_v25, 0.0 }
 0x139   :  { %1213 = vadd.xlane.f32.xlu0 %v1212_v5  ;;  %1195 = vadd.xlane.f32.xlu1 %v1194_v34  ;;  %v1206_v47 = vsel %vm952_vm5, %v1178_v39, 0.0  ;;  %v1031_v59 = vmax.f32 %v1029_v31, %v1030_v40  ;;  %v1200_v48 = vsel %vm952_vm5, %v1176_v43, 0.0  ;;  %v1184_v7 = vmul.f32 %v3070_v9, %v1128_v61 }
 0x13a   :  { %v562_v36 = vadd.f32 %v561_v8, %v449_v26  ;;  %1189 = vadd.xlane.f32.xlu2 %v1188_v32  ;;  %v1182_v13 = vmul.f32 %v3070_v9, %v1126_v30  ;;  %v484_v26 = vpop.f32.mrf.mxu3  ;;  %vm915_vm2 = vcmp.eq.s32.totalorder %v3020_v63, 1  ;;  %v2175_v63 = vld [vmem:[%s3729_s2 + $0xe] ss:$0 sm:$0xff] }
 0x13b   :  { %v1032_v4 = vrot.slane %v1031_v59, 1  ;;  %v1224_v23 = vsel %vm952_vm5, %v1184_v7, 0.0 }
 0x13c   :  { %v683_v38 = vadd.f32 %v2170_v62, %v562_v36  ;;  %v1218_v25 = vsel %vm952_vm5, %v1182_v13, 0.0  ;;  %v485_v13 = vadd.f32 %v484_v26, %v3036_v52  ;;  %v887_v26 = vpop.permute.xlu1 %886 }
 0x13d   :  { %v1033_v24 = vmax.f32 %v1031_v59, %v1032_v4  ;;  %v3117_v59 = vpop.permute.xlu0 %880  ;;  %vm919_vm11 = vcmp.eq.s32.totalorder %v887_v26, 1 }
 0x13e   :  { %v570_v41 = vpop.f32.mrf.mxu2  ;;  %v939_v45 = vsel %vm907_vm3, %v683_v38, -1e+30  ;;  %v338_v29 = vpop.f32.mrf.mxu0  ;;  %vm912_vm3 = vcmp.eq.s32.totalorder %v3002_v35, 1 }
 0x13f   :  { %v1035_v8 = vsel %vm952_vm5, %v939_v45, -inf  ;;  %v451_v53 = vpop.f32.mrf.mxu1  ;;  %2195 = vtanh.f32 %v1033_v24 }
 0x140   :  { %v1036_v56 = vmax.f32 %v1034_v51, %v1035_v8  ;;  %v452_v57 = vadd.f32 %v451_v53, %v338_v29 }
 0x141   :  { %1207 = vadd.xlane.f32.xlu1 %v1206_v47 }
 0x142   :  { %v1037_v62 = vrot.slane %v1036_v56, 4  ;;  %v565_v1 = vadd.f32 %v3049_v16, %v452_v57  ;;  %1201 = vadd.xlane.f32.xlu2 %v1200_v48  ;;  %v594_v51 = vpop.f32.mrf.mxu3 }
 0x144   :  { %v1038_v54 = vmax.f32 %v1036_v56, %v1037_v62  ;;  %v684_v3 = vadd.f32 %v2171_v58, %v565_v1 }
 0x145   :  { %v2196_v29 = vpop.eup %2195  ;;  %v884_v52 = vpop.permute.xlu0 %883 }
 0x146   :  { %v573_v12 = vpop.f32.mrf.mxu2  ;;  %v1039_v14 = vrot.slane %v1038_v54, 2  ;;  %v940_v6 = vsel %vm908_vm4, %v684_v3, -1e+30  ;;  %v341_v20 = vpop.f32.mrf.mxu0  ;;  %vm918_vm9 = vcmp.eq.s32.totalorder %v884_v52, 1  ;;  %vm913_vm4 = vcmp.eq.s32.totalorder %v3005_v42, 1 }
 0x147   :  { %v454_v21 = vpop.f32.mrf.mxu1  ;;  %v1043_v37 = vsel %vm952_vm5, %v940_v6, -inf }
 0x148   :  { %v1040_v16 = vmax.f32 %v1038_v54, %v1039_v14  ;;  %v455_v44 = vadd.f32 %v454_v21, %v341_v20 }
 0x149   :  { %1225 = vadd.xlane.f32.xlu1 %v1224_v23 }
 0x14a   :  { %v1041_v5 = vrot.slane %v1040_v16, 1  ;;  %v568_v34 = vadd.f32 %v567_v15, %v455_v44  ;;  %1219 = vadd.xlane.f32.xlu2 %v1218_v25  ;;  %v597_v6 = vpop.f32.mrf.mxu3 }
 0x14b   :  { %v598_v23 = vadd.f32 %v597_v6, %v485_v13 }
 0x14c   :  { %v1042_v10 = vmax.f32 %v1040_v16, %v1041_v5  ;;  %v685_v31 = vadd.f32 %v2171_v58, %v568_v34  ;;  %v473_v34 = vadd.f32 %v3043_v22, %v2991_v2 }
 0x14e   :  { %v576_v32 = vpop.f32.mrf.mxu2  ;;  %2197 = vtanh.f32 %v1042_v10  ;;  %v941_v33 = vsel %vm909_vm6, %v685_v31, -1e+30  ;;  %v344_v36 = vpop.f32.mrf.mxu0  ;;  %vm916_vm6 = vcmp.eq.s32.totalorder %v3029_v11, 1 }
 0x14f   :  { %v1044_v38 = vsel %vm952_vm5, %v941_v33, -inf  ;;  %v457_v39 = vpop.f32.mrf.mxu1  ;;  %v2173_v33 = vld [vmem:[%s3729_s2 + $0xc] ss:$0 sm:$0xff] }
 0x150   :  { %v1045_v40 = vmax.f32 %v1043_v37, %v1044_v38  ;;  %v458_v43 = vadd.f32 %v457_v39, %v344_v36  ;;  %v2174_v36 = vld [vmem:[%s3729_s2 + $0xd] ss:$0 sm:$0xff]  ;;  %v695_v37 = vadd.f32 %v2167_v50, %v598_v23 }
 0x152   :  { %v1046_v45 = vrot.slane %v1045_v40, 4  ;;  %v571_v53 = vadd.f32 %v570_v41, %v458_v43  ;;  %v482_v41 = vadd.f32 %v3091_v55, %v3026_v28 }
 0x154   :  { %v2198_v15 = vpop.eup %2197  ;;  %v1047_v8 = vmax.f32 %v1045_v40, %v1046_v45  ;;  %v686_v62 = vadd.f32 %v2172_v27, %v571_v53  ;;  %v595_v16 = vadd.f32 %v594_v51, %v482_v41 }
 0x155   :  { %v1163_v56 = vsel %vm1149_vm10, %v2198_v15, %v2196_v29 }
 0x156   :  { %v579_v57 = vpop.f32.mrf.mxu2  ;;  %v1048_v58 = vrot.slane %v1047_v8, 2  ;;  %v347_v47 = vpop.f32.mrf.mxu0  ;;  %v942_v7 = vsel %vm910_vm7, %v686_v62, -1e+30  ;;  %v694_v25 = vadd.f32 %v2167_v50, %v595_v16  ;;  %v479_v50 = vadd.f32 %v3072_v18, %v3015_v0 }
 0x157   :  { %v460_v48 = vpop.f32.mrf.mxu1  ;;  %v1052_v28 = vsel %vm952_vm5, %v942_v7, -inf  ;;  %vm914_vm7 = vcmp.eq.s32.totalorder %v3009_v60, 1 }
 0x158   :  { %v1049_v61 = vmax.f32 %v1047_v8, %v1048_v58  ;;  %v461_v1 = vadd.f32 %v460_v48, %v347_v47  ;;  %v950_v2 = vsel %vm918_vm9, %v694_v25, -1e+30  ;;  %v951_v8 = vsel %vm919_vm11, %v695_v37, -1e+30 }
 0x159   :  { %v1088_v47 = vsel %vm952_vm5, %v950_v2, -inf  ;;  %v1089_v48 = vsel %vm952_vm5, %v951_v8, -inf  ;;  %vm1266_vm9 = vcmask 130112  }
 0x15a   :  { %v1050_v30 = vrot.slane %v1049_v61, 1  ;;  %v574_v54 = vadd.f32 %v573_v12, %v461_v1 }
 0x15c   :  { %v1051_v3 = vmax.f32 %v1049_v61, %v1050_v30  ;;  %v687_v4 = vadd.f32 %v2172_v27, %v574_v54 }
 0x15e   :  { %v3124_v14 = vpop.f32.mrf.mxu2  ;;  %2199 = vtanh.f32 %v1051_v3  ;;  %v943_v20 = vsel %vm911_vm8, %v687_v4, -1e+30  ;;  %v350_v21 = vpop.f32.mrf.mxu0  ;;  %vm917_vm8 = vcmp.eq.s32.totalorder %v3117_v59, 1 }
 0x15f   :  { %v1053_v55 = vsel %vm952_vm5, %v943_v20, -inf  ;;  %v463_v12 = vpop.f32.mrf.mxu1 }
 0x160   :  { %v1054_v44 = vmax.f32 %v1052_v28, %v1053_v55  ;;  %v464_v17 = vadd.f32 %v463_v12, %v350_v21 }
 0x162   :  { %v1055_v24 = vrot.slane %v1054_v44, 4  ;;  %v577_v31 = vadd.f32 %v576_v32, %v464_v17 }
 0x164   :  { %v2200_v5 = vpop.eup %2199  ;;  %v1056_v10 = vmax.f32 %v1054_v44, %v1055_v24  ;;  %v688_v32 = vadd.f32 %v2173_v33, %v577_v31 }
 0x165   :  { %v1164_v38 = vsel %vm1151_vm13, %v2200_v5, %v1163_v56  ;;  %v476_v56 = vadd.f32 %v3046_v49, %v3007_v46  ;;  %v1090_v49 = vmax.f32 %v1088_v47, %v1089_v48  ;;  %v1125_v48 = vld [vmem:[%s3730_s4 + $0x48] sm:$0xff] }
 0x166   :  { %v585_v39 = vpop.f32.mrf.mxu2  ;;  %v1057_v40 = vrot.slane %v1056_v10, 2  ;;  %v353_v45 = vpop.f32.mrf.mxu0  ;;  %v944_v62 = vsel %vm912_vm3, %v688_v32, -1e+30 }
 0x167   :  { %v586_v43 = vadd.f32 %v585_v39, %v473_v34  ;;  %v466_v22 = vpop.f32.mrf.mxu1  ;;  %v1061_v35 = vsel %vm952_vm5, %v944_v62, -inf  ;;  %v1091_v21 = vrot.slane %v1090_v49, 4  ;;  %v1117_v62 = vld [vmem:[%s3730_s4 + $0x8] sm:$0xff] }
 0x168   :  { %v1058_v29 = vmax.f32 %v1056_v10, %v1057_v40  ;;  %v467_v51 = vadd.f32 %v466_v22, %v353_v45 }
 0x169   :  { %v691_v15 = vadd.f32 %v2174_v36, %v586_v43  ;;  %v1092_v11 = vmax.f32 %v1090_v49, %v1091_v21 }
 0x16a   :  { %v1059_v53 = vrot.slane %v1058_v29, 1  ;;  %v580_v58 = vadd.f32 %v579_v57, %v467_v51 }
 0x16b   :  { %v947_v27 = vsel %vm915_vm2, %v691_v15, -1e+30  ;;  %v1093_v60 = vrot.slane %v1092_v11, 2 }
 0x16c   :  { %v1060_v61 = vmax.f32 %v1058_v29, %v1059_v53  ;;  %v689_v1 = vadd.f32 %v2173_v33, %v580_v58  ;;  %v1071_v24 = vsel %vm952_vm5, %v947_v27, -inf }
 0x16d   :  { %v1094_v40 = vmax.f32 %v1092_v11, %v1093_v60 }
 0x16e   :  { %v588_v30 = vpop.f32.mrf.mxu2  ;;  %2201 = vtanh.f32 %v1060_v61  ;;  %v945_v57 = vsel %vm913_vm4, %v689_v1, -1e+30  ;;  %v356_v46 = vpop.f32.mrf.mxu0  ;;  %v1119_v61 = vld [vmem:[%s3730_s4 + $0x18] sm:$0xff] }
 0x16f   :  { %v589_v54 = vadd.f32 %v588_v30, %v476_v56  ;;  %v1062_v41 = vsel %vm952_vm5, %v945_v57, -inf  ;;  %v469_v3 = vpop.f32.mrf.mxu1  ;;  %v1095_v59 = vrot.slane %v1094_v40, 1 }
 0x170   :  { %v1063_v7 = vmax.f32 %v1061_v35, %v1062_v41  ;;  %v470_v13 = vadd.f32 %v469_v3, %v356_v46  ;;  %v1131_v3 = vld [vmem:[%s3730_s4 + $0x78] sm:$0xff] }
 0x171   :  { %v692_v4 = vadd.f32 %v2175_v63, %v589_v54  ;;  %v1096_v53 = vmax.f32 %v1094_v40, %v1095_v59  ;;  %v3226_v40 = vld [vmem:[%s3731_s5] sm:$0x3] }
 0x172   :  { %v1064_v6 = vrot.slane %v1063_v7, 4  ;;  %v583_v42 = vadd.f32 %v3124_v14, %v470_v13  ;;  %vm1239_vm2 = vcmp.gt.f32.partialorder %v3226_v40, 0.0 }
 0x173   :  { %v948_v20 = vsel %vm916_vm6, %v692_v4, -1e+30  ;;  %v1121_v4 = vld [vmem:[%s3730_s4 + $0x28] sm:$0xff]  ;;  %vm1299_vm6 = vcmask 130048  }
 0x174   :  { %v2202_v16 = vpop.eup %2201  ;;  %v1065_v28 = vmax.f32 %v1063_v7, %v1064_v6  ;;  %v690_v55 = vadd.f32 %v2174_v36, %v583_v42  ;;  %v1079_v10 = vsel %vm952_vm5, %v948_v20, -inf  ;;  %v1123_v7 = vld [vmem:[%s3730_s4 + $0x38] sm:$0xff] }
 0x175   :  { %v1165_v12 = vsel %vm1153_vm1, %v2202_v16, %v1164_v38 }
 0x176   :  { %v591_v44 = vpop.f32.mrf.mxu2  ;;  %v1066_v17 = vrot.slane %v1065_v28, 2  ;;  %v946_v23 = vsel %vm914_vm7, %v690_v55, -1e+30 }
 0x177   :  { %v592_v52 = vadd.f32 %v591_v44, %v479_v50  ;;  %v1070_v14 = vsel %vm952_vm5, %v946_v23, -inf  ;;  %v1129_v50 = vld [vmem:[%s3730_s4 + $0x68] sm:$0xff]  ;;  %v1130_v23 = vld [vmem:[%s3730_s4 + $0x70] sm:$0xff] }
 0x178   :  { %v1067_v25 = vmax.f32 %v1065_v28, %v1066_v17  ;;  %v1072_v26 = vmax.f32 %v1070_v14, %v1071_v24  ;;  %v1127_v28 = vld [vmem:[%s3730_s4 + $0x58] sm:$0xff] }
 0x179   :  { %v693_v5 = vadd.f32 %v2175_v63, %v592_v52  ;;  %v1186_v52 = vmul.f32 %v3070_v9, %v1130_v23 }
 0x17a   :  { %v1068_v0 = vrot.slane %v1067_v25, 1  ;;  %v1073_v18 = vrot.slane %v1072_v26, 4 }
 0x17b   :  { %v949_v34 = vsel %vm917_vm8, %v693_v5, -1e+30  ;;  %v1230_v11 = vsel %vm952_vm5, %v1186_v52, 0.0 }
 0x17c   :  { %v1080_v31 = vsel %vm952_vm5, %v949_v34, -inf  ;;  %v1069_v33 = vmax.f32 %v1067_v25, %v1068_v0  ;;  %v1074_v36 = vmax.f32 %v1072_v26, %v1073_v18  ;;  %v1113_v18 = vlaneseq }
 0x17d   :  { %v1081_v37 = vmax.f32 %v1079_v10, %v1080_v31 }
 0x17e   :  { %2203 = vtanh.f32 %v1069_v33  ;;  %v1075_v38 = vrot.slane %v1074_v36, 2  ;;  %v3216_v10 = vand.u32 127, %v1113_v18 }
 0x17f   :  { %v1082_v39 = vrot.slane %v1081_v37, 4 }
 0x180   :  { %v1076_v43 = vmax.f32 %v1074_v36, %v1075_v38  ;;  %v3219_v33 = vadd.s32 4294967288, %v3216_v10 }
 0x181   :  { %v1083_v45 = vmax.f32 %v1081_v37, %v1082_v39 }
 0x182   :  { %v1077_v2 = vrot.slane %v1076_v43, 1 }
 0x183   :  { %v1084_v22 = vrot.slane %v1083_v45, 2 }
 0x184   :  { %v2204_v29 = vpop.eup %2203  ;;  %v1078_v32 = vmax.f32 %v1076_v43, %v1077_v2 }
 0x185   :  { %v1085_v15 = vmax.f32 %v1083_v45, %v1084_v22  ;;  %v1166_v51 = vsel %vm1155_vm0, %v2204_v29, %v1165_v12  ;;  %v1237_v29 = vrot.slane %v3226_v40, 1 }
 0x186   :  { %2205 = vtanh.f32 %v1078_v32 }
 0x187   :  { %v1086_v8 = vrot.slane %v1085_v15, 1  ;;  %vm1240_vm11 = vcmp.gt.f32.partialorder %v1237_v29, 0.0 }
 0x189   :  { %v1087_v27 = vmax.f32 %v1085_v15, %v1086_v8 }
 0x18b   :  { %2207 = vtanh.f32 %v1087_v27 }
 0x18c   :  { %2209 = vtanh.f32 %v1096_v53  ;;  %v2206_v58 = vpop.eup %2205 }
 0x18d   :  { %v1167_v56 = vsel %vm1157_vm12, %v2206_v58, %v1166_v51 }
 0x191   :  { %v2208_v47 = vpop.eup %2207 }
 0x192   :  { %v2210_v1 = vpop.eup %2209  ;;  %v1168_v63 = vsel %vm1159_vm14, %v2208_v47, %v1167_v56 }
 0x193   :  { %v3176_v30 = vsel %vm1161_vm15, %v2210_v1, %v1168_v63  ;;  %v1242_v63 = vsel %vm1240_vm11, 1, %v2259_v19 }
 0x194   :  { %1352 = vmatpush.msrb.mxu3 %v3176_v30  ;;  %v1181_v57 = vmul.f32 %v3176_v30, %v1125_v48  ;;  %v1175_v54 = vmul.f32 %v3176_v30, %v1119_v61  ;;  %v1173_v46 = vmul.f32 %v3176_v30, %v1117_v62  ;;  %v1187_v13 = vmul.f32 %v3176_v30, %v1131_v3 }
 0x195   :  { %v1179_v6 = vmul.f32 %v3176_v30, %v1123_v7  ;;  %v1177_v20 = vmul.f32 %v3176_v30, %v1121_v4  ;;  %v1185_v55 = vmul.f32 %v3176_v30, %v1129_v50  ;;  %v1183_v12 = vmul.f32 %v3176_v30, %v1127_v28 }
 0x196   :  { %1353 = vmatpush.msrb.mxu3 %v3070_v9  ;;  %v1215_v49 = vsel %vm952_vm5, %v1181_v57, 0.0  ;;  %v1197_v35 = vsel %vm952_vm5, %v1175_v54, 0.0  ;;  %v1191_v41 = vsel %vm952_vm5, %v1173_v46, 0.0  ;;  %v1233_v42 = vsel %vm952_vm5, %v1187_v13, 0.0 }
 0x197   :  { %1216 = vadd.xlane.f32.xlu1 %v1215_v49  ;;  %1198 = vadd.xlane.f32.xlu2 %v1197_v35  ;;  %v1209_v21 = vsel %vm952_vm5, %v1179_v6, 0.0  ;;  %v1203_v16 = vsel %vm952_vm5, %v1177_v20, 0.0  ;;  %v1227_v44 = vsel %vm952_vm5, %v1185_v55, 0.0  ;;  %v1221_v17 = vsel %vm952_vm5, %v1183_v12, 0.0 }
 0x198   :  { %1192 = vadd.xlane.f32.xlu0 %v1191_v41  ;;  %v1241_v57 = vsel %vm1239_vm2, 1, %v2259_v19  ;;  %v1244_v4 = vperm.slane %v1242_v63, 0 }
 0x199   :  { %v1243_v13 = vperm.slane %v1241_v57, 0 }
 0x19a   :  { %vm1246_vm3 = vcmp.eq.s32.totalorder %v1244_v4, 1 }
 0x19b   :  { %vm1245_vm4 = vcmp.eq.s32.totalorder %v1243_v13, 1 }
 0x19f   :  { %1234 = vadd.xlane.f32.xlu1 %v1233_v42  ;;  %1210 = vadd.xlane.f32.xlu2 %v1209_v21 }
 0x1a0   :  { %1204 = vadd.xlane.f32.xlu0 %v1203_v16 }
 0x1a7   :  { %1228 = vadd.xlane.f32.xlu2 %v1227_v44 }
 0x1a8   :  { %1222 = vadd.xlane.f32.xlu0 %v1221_v17 }
 0x1ac   :  { %v1196_v25 = vpop.xlane.xlu1 %1195  ;;  %v1214_v5 = vpop.xlane.xlu0 %1213 }
 0x1ad   :  { %v1190_v24 = vpop.xlane.xlu2 %1189  ;;  %v1268_v45 = vperm.slane %v1196_v25, %v3216_v10  ;;  %v1277_v54 = vperm.slane %v1214_v5, %v3216_v10  ;;  %v2059_v25 = vld [vmem:[%s3730_s4 + $0x98] sm:$0xff] }
 0x1ae   :  { %v1263_v2 = vperm.slane %v1190_v24, %v3216_v10 }
 0x1b0   :  { %1231 = vadd.xlane.f32.xlu0 %v1230_v11  ;;  %v2056_v11 = vld [vmem:[%s3730_s4 + $0x80] sm:$0xff] }
 0x1b1   :  { %v1459_v24 = vmul.f32 %v2056_v11, %v3070_v9  ;;  %v2069_v11 = vld [vmem:[%s3730_s4 + $0xe8] sm:$0xff] }
 0x1b4   :  { %v1208_v0 = vpop.xlane.xlu1 %1207 }
 0x1b5   :  { %v1202_v14 = vpop.xlane.xlu2 %1201  ;;  %v1274_v53 = vperm.slane %v1208_v0, %v3216_v10  ;;  %v2062_v0 = vld [vmem:[%s3730_s4 + $0xb0] sm:$0xff] }
 0x1b6   :  { %v1271_v22 = vperm.slane %v1202_v14, %v3216_v10  ;;  %v1475_v14 = vsel %vm952_vm5, %v1459_v24, 0.0  ;;  %v1465_v18 = vmul.f32 %v2062_v0, %v3070_v9  ;;  %v1367_v0 = vld [vmem:[%s3732_s7 + $0x20] sm:$0xff] }
 0x1bc   :  { %v1226_v31 = vpop.xlane.xlu1 %1225 }
 0x1bd   :  { %v1220_v26 = vpop.xlane.xlu2 %1219  ;;  %v1283_v41 = vperm.slane %v1226_v31, %v3216_v10 }
 0x1be   :  { %v1280_v1 = vperm.slane %v1220_v26, %v3216_v10  ;;  %v1462_v26 = vmul.f32 %v2059_v25, %v3176_v30 }
 0x1c0   :  { %v1484_v5 = vsel %vm952_vm5, %v1462_v26, 0.0 }
 0x20a   :  { %v1199_v34 = vpop.xlane.xlu2 %1198  ;;  %v1217_v59 = vpop.xlane.xlu1 %1216 }
 0x20b   :  { %v1193_v60 = vpop.xlane.xlu0 %1192  ;;  %v1269_v38 = vperm.slane %v1199_v34, %v3219_v33  ;;  %v1278_v62 = vperm.slane %v1217_v59, %v3219_v33  ;;  %v1493_v34 = vsel %vm952_vm5, %v1465_v18, 0.0  ;;  %v1366_v18 = vld [vmem:[%s3732_s7 + $0x18] sm:$0xff] }
 0x20c   :  { %v1265_v39 = vperm.slane %v1193_v60, %v3219_v33  ;;  %v2065_v60 = vld [vmem:[%s3730_s4 + $0xc8] sm:$0xff] }
 0x20d   :  { %v1270_v32 = vsel %vm1266_vm9, %v1269_v38, %v1268_v45  ;;  %v1279_v3 = vsel %vm1266_vm9, %v1278_v62, %v1277_v54  ;;  %v1468_v31 = vmul.f32 %v2065_v60, %v3176_v30  ;;  %v1364_v60 = vld [vmem:[%s3732_s7 + $0x8] sm:$0xff] }
 0x20e   :  { %v1267_v15 = vsel %vm1266_vm9, %v1265_v39, %v1263_v2 }
 0x20f   :  { %v1289_v27 = vsel %vm1149_vm10, %v1270_v32, %v1267_v15 }
 0x212   :  { %v1211_v36 = vpop.xlane.xlu2 %1210  ;;  %v1235_v7 = vpop.xlane.xlu1 %1234 }
 0x213   :  { %v1205_v37 = vpop.xlane.xlu0 %1204  ;;  %v1275_v51 = vperm.slane %v1211_v36, %v3219_v33  ;;  %v1287_v16 = vperm.slane %v1235_v7, %v3219_v33  ;;  %v1502_v36 = vsel %vm952_vm5, %v1468_v31, 0.0  ;;  %v1363_v31 = vld [vmem:[%s3732_s7] sm:$0xff] }
 0x214   :  { %v1272_v43 = vperm.slane %v1205_v37, %v3219_v33  ;;  %v2068_v37 = vld [vmem:[%s3730_s4 + $0xe0] sm:$0xff] }
 0x215   :  { %v1276_v56 = vsel %vm1266_vm9, %v1275_v51, %v1274_v53  ;;  %v1471_v38 = vmul.f32 %v2068_v37, %v3070_v9  ;;  %v1313_v53 = vperm.slane %v1237_v29, 0 }
 0x216   :  { %v1273_v8 = vsel %vm1266_vm9, %v1272_v43, %v1271_v22  ;;  %v2071_v43 = vld [vmem:[%s3730_s4 + $0xf8] sm:$0xff] }
 0x217   :  { %v1290_v47 = vsel %vm1151_vm13, %v1273_v8, %v1289_v27  ;;  %v1511_v39 = vsel %vm952_vm5, %v1471_v38, 0.0  ;;  %v1474_v45 = vmul.f32 %v2071_v43, %v3176_v30  ;;  %v1312_v27 = vperm.slane %v3226_v40, 0  ;;  %v2057_v40 = vld [vmem:[%s3730_s4 + $0x88] sm:$0xff] }
 0x218   :  { %v1291_v46 = vsel %vm1153_vm1, %v1276_v56, %v1290_v47  ;;  %v1460_v63 = vmul.f32 %v2057_v40, %v3176_v30 }
 0x219   :  { %v1292_v6 = vsel %vm1155_vm0, %v1279_v3, %v1291_v46  ;;  %v1520_v2 = vsel %vm952_vm5, %v1474_v45, 0.0  ;;  %v2061_v46 = vld [vmem:[%s3730_s4 + $0xa8] sm:$0xff] }
 0x21a   :  { %v1229_v48 = vpop.xlane.xlu2 %1228  ;;  %v1478_v54 = vsel %vm952_vm5, %v1460_v63, 0.0  ;;  %v1464_v3 = vmul.f32 %v2061_v46, %v3176_v30 }
 0x21b   :  { %v1223_v58 = vpop.xlane.xlu0 %1222  ;;  %v1284_v49 = vperm.slane %v1229_v48, %v3219_v33 }
 0x21c   :  { %v1281_v61 = vperm.slane %v1223_v58, %v3219_v33  ;;  %v1490_v4 = vsel %vm952_vm5, %v1464_v3, 0.0 }
 0x21d   :  { %v1285_v20 = vsel %vm1266_vm9, %v1284_v49, %v1283_v41  ;;  %v2060_v49 = vld [vmem:[%s3730_s4 + $0xa0] sm:$0xff]  ;;  %v1369_v41 = vld [vmem:[%s3732_s7 + $0x30] sm:$0xff] }
 0x21e   :  { %v1282_v35 = vsel %vm1266_vm9, %v1281_v61, %v1280_v1  ;;  %v2058_v1 = vld [vmem:[%s3730_s4 + $0x90] sm:$0xff]  ;;  %v1463_v7 = vmul.f32 %v2060_v49, %v3070_v9 }
 0x21f   :  { %v1293_v21 = vsel %vm1157_vm12, %v1282_v35, %v1292_v6  ;;  %v1461_v29 = vmul.f32 %v2058_v1, %v3070_v9  ;;  %v1370_v35 = vld [vmem:[%s3732_s7 + $0x38] sm:$0xff]  ;;  %v2064_v6 = vld [vmem:[%s3730_s4 + $0xc0] sm:$0xff] }
 0x220   :  { %v1294_v55 = vsel %vm1159_vm14, %v1285_v20, %v1293_v21  ;;  %1389 = vmatpush.msra.mxu3 %v1370_v35  ;;  %v1487_v13 = vsel %vm952_vm5, %v1463_v7, 0.0  ;;  %v2063_v20 = vld [vmem:[%s3730_s4 + $0xb8] sm:$0xff] }
 0x221   :  { %v1481_v57 = vsel %vm952_vm5, %v1461_v29, 0.0  ;;  %v1466_v21 = vmul.f32 %v2063_v20, %v3176_v30 }
 0x222   :  { %1390 = vmatpush.msra.mxu3 %v1369_v41 }
 0x223   :  { %v1232_v42 = vpop.xlane.xlu0 %1231 }
 0x224   :  { %v1286_v50 = vperm.slane %v1232_v42, %v3216_v10  ;;  %v1467_v42 = vmul.f32 %v2064_v6, %v3070_v9 }
 0x226   :  { %v1288_v28 = vsel %vm1266_vm9, %v1287_v16, %v1286_v50  ;;  %v1499_v16 = vsel %vm952_vm5, %v1467_v42, 0.0  ;;  %v1496_v50 = vsel %vm952_vm5, %v1466_v21, 0.0 }
 0x227   :  { %v1295_v12 = vsel %vm1161_vm15, %v1288_v28, %v1294_v55  ;;  %v2067_v28 = vld [vmem:[%s3730_s4 + $0xd8] sm:$0xff]  ;;  %v2066_v55 = vld [vmem:[%s3730_s4 + $0xd0] sm:$0xff] }
 0x228   :  { %v1298_v44 = vsel %vm1246_vm3, %v1295_v12, -1e+30  ;;  %v1297_v17 = vsel %vm1245_vm4, %v1295_v12, -1e+30  ;;  %v1470_v12 = vmul.f32 %v2067_v28, %v3176_v30 }
 0x229   :  { %v1303_v23 = vsel %vm1299_vm6, %v1298_v44, -inf  ;;  %v1300_v52 = vsel %vm1299_vm6, %v1297_v17, -inf }
 0x22a   :  { %1304 = vmax.xlane.f32.xlu0 %v1303_v23  ;;  %1301 = vmax.xlane.f32.xlu2 %v1300_v52  ;;  %v2070_v52 = vld [vmem:[%s3730_s4 + $0xf0] sm:$0xff] }
 0x22b   :  { %v1473_v24 = vmul.f32 %v2070_v52, %v3070_v9 }
 0x22d   :  { %v1517_v25 = vsel %vm952_vm5, %v1473_v24, 0.0 }
 0x232   :  { %1476 = vadd.xlane.f32.xlu0 %v1475_v14  ;;  %v1472_v14 = vmul.f32 %v2069_v11, %v3176_v30 }
 0x234   :  { %v1514_v26 = vsel %vm952_vm5, %v1472_v14, 0.0 }
 0x23a   :  { %1485 = vadd.xlane.f32.xlu0 %v1484_v5  ;;  %v1368_v5 = vld [vmem:[%s3732_s7 + $0x28] sm:$0xff] }
 0x23b   :  { %1391 = vmatpush.msra.mxu3 %v1368_v5 }
 0x23d   :  { %1392 = vmatpush.msra.mxu3 %v1367_v0 }
 0x23f   :  { %1393 = vmatpush.msra.mxu3 %v1366_v18 }
 0x242   :  { %1494 = vadd.xlane.f32.xlu0 %v1493_v34  ;;  %v1365_v34 = vld [vmem:[%s3732_s7 + $0x10] sm:$0xff] }
 0x243   :  { %1394 = vmatpush.msra.mxu3 %v1365_v34 }
 0x245   :  { %1395 = vmatpush.msra.mxu3 %v1364_v60 }
 0x247   :  { %1396 = vmatpush.msra.mxu3 %v1363_v31 }
 0x24a   :  { %1503 = vadd.xlane.f32.xlu0 %v1502_v36 }
 0x252   :  { %1512 = vadd.xlane.f32.xlu0 %v1511_v39 }
 0x25a   :  { %1521 = vadd.xlane.f32.xlu0 %v1520_v2 }
 0x29d   :  { %v1305_v22 = vpop.xlane.xlu0 %1304  ;;  %v1302_v59 = vpop.xlane.xlu2 %1301 }
 0x29e   :  { %v1307_v32 = vsub.f32 %v1298_v44, %v1305_v22  ;;  %v1306_v15 = vsub.f32 %v1297_v17, %v1302_v59  ;;  %v1469_v44 = vmul.f32 %v2066_v55, %v3070_v9  ;;  %v1508_v17 = vsel %vm952_vm5, %v1470_v12, 0.0 }
 0x2a0   :  { %v1310_v51 = vmul.f32 1.442695, %v1307_v32  ;;  %v1308_v8 = vmul.f32 1.442695, %v1306_v15  ;;  %v1505_v23 = vsel %vm952_vm5, %v1469_v44, 0.0 }
 0x2a2   :  { %2211 = vpow2.f32 %v1310_v51 }
 0x2a3   :  { %2213 = vpow2.f32 %v1308_v8 }
 0x2a5   :  { %v1477_v36 = vpop.xlane.xlu0 %1476 }
 0x2a8   :  { %v2212_v58 = vpop.eup %2211 }
 0x2a9   :  { %v2214_v56 = vpop.eup %2213  ;;  %v3298_v47 = vmul.f32 %v2212_v58, %v1313_v53 }
 0x2aa   :  { %v3300_v48 = vmul.f32 %v2214_v56, %v1312_v27 }
 0x2ab   :  { %v1321_v61 = vsel %vm1299_vm6, %v3298_v47, 0.0 }
 0x2ac   :  { %1322 = vadd.xlane.f32.xlu2 %v1321_v61  ;;  %v1318_v62 = vsel %vm1299_vm6, %v3300_v48, 0.0 }
 0x2ad   :  { %1319 = vadd.xlane.f32.xlu1 %v1318_v62  ;;  %v1486_v37 = vpop.xlane.xlu0 %1485 }
 0x2ae   :  { %v1554_v46 = vperm.slane %v1486_v37, %v3219_v33 }
 0x2b4   :  { %1482 = vadd.xlane.f32.xlu2 %v1481_v57 }
 0x2b5   :  { %1479 = vadd.xlane.f32.xlu1 %v1478_v54  ;;  %v1495_v2 = vpop.xlane.xlu0 %1494  ;;  %v1550_v54 = vperm.slane %v1477_v36, %v3216_v10 }
 0x2b6   :  { %v1559_v41 = vperm.slane %v1495_v2, %v3216_v10  ;;  %v2088_v2 = vld [vmem:[%s3730_s4 + $0x100] sm:$0xff] }
 0x2bc   :  { %1491 = vadd.xlane.f32.xlu2 %v1490_v4 }
 0x2bd   :  { %1488 = vadd.xlane.f32.xlu1 %v1487_v13  ;;  %v1504_v27 = vpop.xlane.xlu0 %1503 }
 0x2c4   :  { %1500 = vadd.xlane.f32.xlu2 %v1499_v16 }
 0x2c5   :  { %1497 = vadd.xlane.f32.xlu1 %v1496_v50  ;;  %v1513_v62 = vpop.xlane.xlu0 %1512  ;;  %v1563_v50 = vperm.slane %v1504_v27, %v3219_v33 }
 0x2c6   :  { %v1568_v5 = vperm.slane %v1513_v62, %v3216_v10  ;;  %v2100_v62 = vld [vmem:[%s3730_s4 + $0x160] sm:$0xff] }
 0x2cc   :  { %1509 = vadd.xlane.f32.xlu2 %v1508_v17 }
 0x2cd   :  { %1506 = vadd.xlane.f32.xlu1 %v1505_v23  ;;  %v1522_v28 = vpop.xlane.xlu0 %1521 }
 0x2ce   :  { %v1572_v24 = vperm.slane %v1522_v28, %v3219_v33 }
 0x2d4   :  { %1518 = vadd.xlane.f32.xlu2 %v1517_v25 }
 0x2d5   :  { %1515 = vadd.xlane.f32.xlu1 %v1514_v26 }
 0x31f   :  { %v1323_v38 = vpop.xlane.xlu2 %1322 }
 0x320   :  { %v1320_v39 = vpop.xlane.xlu1 %1319  ;;  %vm1325_vm8 = vcmp.gt.f32.partialorder %v1323_v38, 0.0 }
 0x321   :  { %vm1324_vm7 = vcmp.gt.f32.partialorder %v1320_v39, 0.0  ;;  %v1327_v45 = vsel %vm1325_vm8, %v1323_v38, 1.0 }
 0x322   :  { %v1326_v43 = vsel %vm1324_vm7, %v1320_v39, 1.0 }
 0x323   :  { %2215 = vrcp.f32 %v1326_v43 }
 0x324   :  { %2217 = vrcp.f32 %v1327_v45 }
 0x327   :  { %v1483_v22 = vpop.xlane.xlu2 %1482 }
 0x328   :  { %v1480_v59 = vpop.xlane.xlu1 %1479  ;;  %v1553_v29 = vperm.slane %v1483_v22, %v3216_v10  ;;  %v1746_v22 = vmul.f32 %v2088_v2, %v3070_v9  ;;  %v2101_v2 = vld [vmem:[%s3730_s4 + $0x168] sm:$0xff] }
 0x329   :  { %v2216_v32 = vpop.eup %2215  ;;  %v1551_v40 = vperm.slane %v1480_v59, %v3219_v33 }
 0x32a   :  { %v1330_v15 = vmul.f32 %v2216_v32, %v3300_v48  ;;  %v2218_v51 = vpop.eup %2217  ;;  %v3389_v48 = vld [vmem:[%s3731_s5 + $0x2] sm:$0x3]  ;;  %v1555_v7 = vsel %vm1266_vm9, %v1554_v46, %v1553_v29  ;;  %v1762_v59 = vsel %vm952_vm5, %v1746_v22, 0.0  ;;  %v2091_v32 = vld [vmem:[%s3730_s4 + $0x118] sm:$0xff] }
 0x32b   :  { %v1331_v58 = vmul.f32 %v2218_v51, %v3298_v47  ;;  %v1524_v1 = vrot.slane %v3389_v48, 1  ;;  %vm1526_vm2 = vcmp.gt.f32.partialorder %v3389_v48, 0.0  ;;  %v1552_v3 = vsel %vm1266_vm9, %v1551_v40, %v1550_v54 }
 0x32c   :  { %2052 = vmatmul.msk.f32.vlgmr.msrb.gmra.mxu3 %vm1299_vm6, %v1330_v15  ;;  %v1528_v16 = vsel %vm1526_vm2, 1, %v2259_v19  ;;  %v1574_v55 = vsel %vm1149_vm10, %v1555_v7, %v1552_v3  ;;  %v1749_v15 = vmul.f32 %v2091_v32, %v3176_v30  ;;  %v1758_v40 = vmul.f32 %v2100_v62, %v3070_v9  ;;  %v2077_v62 = vld [vmem:[%s3732_s7 + $0x40] sm:$0xff] }
 0x32d   :  { %1636 = vmatpush.msrb.mxu3 %v3176_v30  ;;  %vm1527_vm11 = vcmp.gt.f32.partialorder %v1524_v1, 0.0  ;;  %v1530_v11 = vperm.slane %v1528_v16, 0 }
 0x32e   :  { %v1529_v6 = vsel %vm1527_vm11, 1, %v2259_v19  ;;  %v1771_v51 = vsel %vm952_vm5, %v1749_v15, 0.0  ;;  %v1798_v29 = vsel %vm952_vm5, %v1758_v40, 0.0 }
 0x32f   :  { %1637 = vmatpush.msrb.mxu3 %v3070_v9  ;;  %v1492_v8 = vpop.xlane.xlu2 %1491  ;;  %v1531_v52 = vperm.slane %v1529_v6, 0  ;;  %vm1532_vm4 = vcmp.eq.s32.totalorder %v1530_v11, 1  ;;  %v1596_v6 = vperm.slane %v3389_v48, 0  ;;  %v2089_v48 = vld [vmem:[%s3730_s4 + $0x108] sm:$0xff] }
 0x330   :  { %v1489_v53 = vpop.xlane.xlu1 %1488  ;;  %v1557_v47 = vperm.slane %v1492_v8, %v3219_v33  ;;  %v2094_v8 = vld [vmem:[%s3730_s4 + $0x130] sm:$0xff] }
 0x331   :  { %v1556_v63 = vperm.slane %v1489_v53, %v3216_v10  ;;  %vm1533_vm3 = vcmp.eq.s32.totalorder %v1531_v52, 1  ;;  %v1752_v53 = vmul.f32 %v2094_v8, %v3070_v9  ;;  %v2092_v52 = vld [vmem:[%s3730_s4 + $0x120] sm:$0xff]  ;;  %v2083_v8 = vld [vmem:[%s3732_s7 + $0x70] sm:$0xff] }
 0x333   :  { %v1558_v4 = vsel %vm1266_vm9, %v1557_v47, %v1556_v63  ;;  %v1780_v27 = vsel %vm952_vm5, %v1752_v53, 0.0  ;;  %v2103_v63 = vld [vmem:[%s3730_s4 + $0x178] sm:$0xff]  ;;  %v2082_v53 = vld [vmem:[%s3732_s7 + $0x68] sm:$0xff] }
 0x334   :  { %2053 = vmatmul.msk.f32.gmra.mxu3 %vm1299_vm6, %v1331_v58  ;;  %v1575_v12 = vsel %vm1151_vm13, %v1558_v4, %v1574_v55  ;;  %v2097_v58 = vld [vmem:[%s3730_s4 + $0x148] sm:$0xff]  ;;  %v1761_v47 = vmul.f32 %v2103_v63, %v3176_v30  ;;  %v2090_v55 = vld [vmem:[%s3730_s4 + $0x110] sm:$0xff] }
 0x337   :  { %v1501_v56 = vpop.xlane.xlu2 %1500 }
 0x338   :  { %v1498_v61 = vpop.xlane.xlu1 %1497  ;;  %v1562_v13 = vperm.slane %v1501_v56, %v3216_v10  ;;  %v1755_v56 = vmul.f32 %v2097_v58, %v3176_v30  ;;  %v2080_v58 = vld [vmem:[%s3732_s7 + $0x58] sm:$0xff] }
 0x339   :  { %v1560_v49 = vperm.slane %v1498_v61, %v3219_v33 }
 0x33a   :  { %v1564_v17 = vsel %vm1266_vm9, %v1563_v50, %v1562_v13  ;;  %v1789_v61 = vsel %vm952_vm5, %v1755_v56, 0.0  ;;  %v1597_v13 = vperm.slane %v1524_v1, 0  ;;  %v1748_v1 = vmul.f32 %v2090_v55, %v3070_v9  ;;  %v2079_v56 = vld [vmem:[%s3732_s7 + $0x50] sm:$0xff] }
 0x33b   :  { %v1561_v20 = vsel %vm1266_vm9, %v1560_v49, %v1559_v41 }
 0x33c   :  { %v1576_v44 = vsel %vm1153_vm1, %v1561_v20, %v1575_v12  ;;  %v1747_v12 = vmul.f32 %v2089_v48, %v3176_v30 }
 0x33d   :  { %v1577_v18 = vsel %vm1155_vm0, %v1564_v17, %v1576_v44  ;;  %v1768_v44 = vsel %vm952_vm5, %v1748_v1, 0.0 }
 0x33e   :  { %v1765_v17 = vsel %vm952_vm5, %v1747_v12, 0.0 }
 0x33f   :  { %v1510_v57 = vpop.xlane.xlu2 %1509 }
 0x340   :  { %v1507_v35 = vpop.xlane.xlu1 %1506  ;;  %v1566_v21 = vperm.slane %v1510_v57, %v3219_v33  ;;  %v1807_v57 = vsel %vm952_vm5, %v1761_v47, 0.0 }
 0x341   :  { %v1565_v42 = vperm.slane %v1507_v35, %v3216_v10 }
 0x343   :  { %v1567_v14 = vsel %vm1266_vm9, %v1566_v21, %v1565_v42 }
 0x344   :  { %v1578_v31 = vsel %vm1157_vm12, %v1567_v14, %v1577_v18 }
 0x347   :  { %v1519_v23 = vpop.xlane.xlu2 %1518 }
 0x348   :  { %v1516_v25 = vpop.xlane.xlu1 %1515  ;;  %v1571_v26 = vperm.slane %v1519_v23, %v3216_v10  ;;  %v2093_v23 = vld [vmem:[%s3730_s4 + $0x128] sm:$0xff] }
 0x349   :  { %v1569_v0 = vperm.slane %v1516_v25, %v3219_v33  ;;  %v1751_v11 = vmul.f32 %v2093_v23, %v3176_v30 }
 0x34a   :  { %v1573_v34 = vsel %vm1266_vm9, %v1572_v24, %v1571_v26  ;;  %v1750_v24 = vmul.f32 %v2092_v52, %v3070_v9  ;;  %v2096_v26 = vld [vmem:[%s3730_s4 + $0x140] sm:$0xff] }
 0x34b   :  { %v1570_v60 = vsel %vm1266_vm9, %v1569_v0, %v1568_v5  ;;  %v1777_v14 = vsel %vm952_vm5, %v1751_v11, 0.0  ;;  %v2095_v5 = vld [vmem:[%s3730_s4 + $0x138] sm:$0xff]  ;;  %v1754_v0 = vmul.f32 %v2096_v26, %v3070_v9 }
 0x34c   :  { %v1579_v36 = vsel %vm1159_vm14, %v1570_v60, %v1578_v31  ;;  %v1774_v25 = vsel %vm952_vm5, %v1750_v24, 0.0  ;;  %v1753_v18 = vmul.f32 %v2095_v5, %v3176_v30  ;;  %v2099_v31 = vld [vmem:[%s3730_s4 + $0x158] sm:$0xff] }
 0x34d   :  { %v1580_v37 = vsel %vm1161_vm15, %v1573_v34, %v1579_v36  ;;  %v1786_v34 = vsel %vm952_vm5, %v1754_v0, 0.0  ;;  %v2098_v36 = vld [vmem:[%s3730_s4 + $0x150] sm:$0xff] }
 0x34e   :  { %v1583_v38 = vsel %vm1533_vm3, %v1580_v37, -1e+30  ;;  %v1582_v39 = vsel %vm1532_vm4, %v1580_v37, -1e+30  ;;  %v1783_v60 = vsel %vm952_vm5, %v1753_v18, 0.0  ;;  %v1757_v37 = vmul.f32 %v2099_v31, %v3176_v30 }
 0x34f   :  { %v1587_v43 = vsel %vm1299_vm6, %v1583_v38, -inf  ;;  %v1584_v45 = vsel %vm1299_vm6, %v1582_v39, -inf }
 0x350   :  { %1588 = vmax.xlane.f32.xlu2 %v1587_v43  ;;  %1585 = vmax.xlane.f32.xlu1 %v1584_v45  ;;  %v2102_v45 = vld [vmem:[%s3730_s4 + $0x170] sm:$0xff] }
 0x351   :  { %v1760_v22 = vmul.f32 %v2102_v45, %v3070_v9 }
 0x353   :  { %v1804_v32 = vsel %vm952_vm5, %v1760_v22, 0.0 }
 0x358   :  { %1763 = vadd.xlane.f32.xlu2 %v1762_v59  ;;  %v1759_v59 = vmul.f32 %v2101_v2, %v3176_v30 }
 0x35a   :  { %v1801_v15 = vsel %vm952_vm5, %v1759_v59, 0.0 }
 0x360   :  { %1772 = vadd.xlane.f32.xlu2 %v1771_v51  ;;  %v2084_v51 = vld [vmem:[%s3732_s7 + $0x78] sm:$0xff] }
 0x368   :  { %1781 = vadd.xlane.f32.xlu2 %v1780_v27  ;;  %v2081_v27 = vld [vmem:[%s3732_s7 + $0x60] sm:$0xff] }
 0x370   :  { %1790 = vadd.xlane.f32.xlu2 %v1789_v61  ;;  %v2078_v61 = vld [vmem:[%s3732_s7 + $0x48] sm:$0xff] }
 0x378   :  { %1799 = vadd.xlane.f32.xlu2 %v1798_v29 }
 0x380   :  { %1808 = vadd.xlane.f32.xlu2 %v1807_v57 }
 0x3af   :  { %v3460_v54 = vpop.f32.mrf.mxu3 }
 0x3b0   :  { %2054 = vmatmul.msk.f32.vlgmr.msra.gmra.mxu3 %vm952_vm5, %v3460_v54 }
 0x3b1   :  { %1676 = vmatpush.msra.mxu3 %v2084_v51 }
 0x3b3   :  { %1677 = vmatpush.msra.mxu3 %v2083_v8 }
 0x3b5   :  { %1678 = vmatpush.msra.mxu3 %v2082_v53 }
 0x3b7   :  { %v3464_v46 = vpop.f32.mrf.mxu3  ;;  %1679 = vmatpush.msra.mxu3 %v2081_v27 }
 0x3b8   :  { %2055 = vmatmul.msk.f32.gmra.mxu3 %vm952_vm5, %v3464_v46 }
 0x3b9   :  { %1680 = vmatpush.msra.mxu3 %v2080_v58 }
 0x3bb   :  { %1681 = vmatpush.msra.mxu3 %v2079_v56 }
 0x3bd   :  { %1682 = vmatpush.msra.mxu3 %v2078_v61 }
 0x3bf   :  { %1683 = vmatpush.msra.mxu3 %v2077_v62 }
 0x3c3   :  { %v1589_v49 = vpop.xlane.xlu2 %1588  ;;  %v1586_v35 = vpop.xlane.xlu1 %1585 }
 0x3c4   :  { %v1591_v41 = vsub.f32 %v1583_v38, %v1589_v49  ;;  %v1590_v3 = vsub.f32 %v1582_v39, %v1586_v35  ;;  %v1756_v38 = vmul.f32 %v2098_v36, %v3070_v9  ;;  %v1795_v39 = vsel %vm952_vm5, %v1757_v37, 0.0 }
 0x3c6   :  { %v1594_v7 = vmul.f32 1.442695, %v1591_v41  ;;  %v1592_v4 = vmul.f32 1.442695, %v1590_v3  ;;  %v1792_v43 = vsel %vm952_vm5, %v1756_v38, 0.0 }
 0x3c8   :  { %2219 = vpow2.f32 %v1594_v7 }
 0x3c9   :  { %2221 = vpow2.f32 %v1592_v4 }
 0x3cb   :  { %v1764_v40 = vpop.xlane.xlu2 %1763 }
 0x3ce   :  { %v2220_v20 = vpop.eup %2219 }
 0x3cf   :  { %v2222_v42 = vpop.eup %2221  ;;  %v3471_v21 = vmul.f32 %v2220_v20, %v1597_v13 }
 0x3d0   :  { %v3473_v16 = vmul.f32 %v2222_v42, %v1596_v6 }
 0x3d1   :  { %v1605_v50 = vsel %vm1299_vm6, %v3471_v21, 0.0 }
 0x3d2   :  { %1606 = vadd.xlane.f32.xlu1 %v1605_v50  ;;  %v1602_v28 = vsel %vm1299_vm6, %v3473_v16, 0.0 }
 0x3d3   :  { %1603 = vadd.xlane.f32.xlu0 %v1602_v28  ;;  %v1773_v29 = vpop.xlane.xlu2 %1772 }
 0x3d4   :  { %v1841_v23 = vperm.slane %v1773_v29, %v3219_v33 }
 0x3da   :  { %1769 = vadd.xlane.f32.xlu1 %v1768_v44 }
 0x3db   :  { %1766 = vadd.xlane.f32.xlu0 %v1765_v17  ;;  %v1782_v35 = vpop.xlane.xlu2 %1781  ;;  %v1837_v17 = vperm.slane %v1764_v40, %v3216_v10 }
 0x3dc   :  { %v1846_v24 = vperm.slane %v1782_v35, %v3216_v10 }
 0x3e2   :  { %1778 = vadd.xlane.f32.xlu1 %v1777_v14 }
 0x3e3   :  { %1775 = vadd.xlane.f32.xlu0 %v1774_v25  ;;  %v1791_v42 = vpop.xlane.xlu2 %1790 }
 0x3e4   :  { %v1850_v36 = vperm.slane %v1791_v42, %v3219_v33 }
 0x3ea   :  { %1787 = vadd.xlane.f32.xlu1 %v1786_v34 }
 0x3eb   :  { %1784 = vadd.xlane.f32.xlu0 %v1783_v60  ;;  %v1800_v48 = vpop.xlane.xlu2 %1799 }
 0x3ec   :  { %v1855_v8 = vperm.slane %v1800_v48, %v3216_v10 }
 0x3f2   :  { %1796 = vadd.xlane.f32.xlu1 %v1795_v39 }
 0x3f3   :  { %1793 = vadd.xlane.f32.xlu0 %v1792_v43  ;;  %v1809_v37 = vpop.xlane.xlu2 %1808 }
 0x3fa   :  { %1805 = vadd.xlane.f32.xlu1 %v1804_v32  ;;  %v1859_v32 = vperm.slane %v1809_v37, %v3219_v33 }
 0x3fb   :  { %1802 = vadd.xlane.f32.xlu0 %v1801_v15 }
 0x445   :  { %v1607_v63 = vpop.xlane.xlu1 %1606 }
 0x446   :  { %v1604_v47 = vpop.xlane.xlu0 %1603  ;;  %vm1609_vm8 = vcmp.gt.f32.partialorder %v1607_v63, 0.0 }
 0x447   :  { %vm1608_vm7 = vcmp.gt.f32.partialorder %v1604_v47, 0.0  ;;  %v1611_v49 = vsel %vm1609_vm8, %v1607_v63, 1.0 }
 0x448   :  { %v1610_v57 = vsel %vm1608_vm7, %v1604_v47, 1.0 }
 0x449   :  { %2223 = vrcp.f32 %v1610_v57  ;;  %v1361_v57 = vld [vmem:[%s3734_s6] sm:$0xff] }
 0x44a   :  { %2225 = vrcp.f32 %v1611_v49  ;;  %v1404_v49 = vmul.f32 %v1361_v57, %v3460_v54 }
 0x44c   :  { %v1406_v35 = vsel %vm952_vm5, %v1404_v49, 0.0  ;;  %v2110_v49 = vld [vmem:[%s3732_s7 + $0x88] sm:$0xff] }
 0x44d   :  { %v1770_v41 = vpop.xlane.xlu1 %1769 }
 0x44e   :  { %v1767_v3 = vpop.xlane.xlu0 %1766 }
 0x44f   :  { %v2224_v7 = vpop.eup %2223  ;;  %v1838_v1 = vperm.slane %v1767_v3, %v3219_v33 }
 0x450   :  { %v1614_v4 = vmul.f32 %v2224_v7, %v3473_v16  ;;  %v2226_v13 = vpop.eup %2225  ;;  %v3562_v16 = vld [vmem:[%s3731_s5 + $0x4] sm:$0x3] }
 0x451   :  { %v1615_v50 = vmul.f32 %v2226_v13, %v3471_v21  ;;  %vm1813_vm2 = vcmp.gt.f32.partialorder %v3562_v16, 0.0  ;;  %v1839_v14 = vsel %vm1266_vm9, %v1838_v1, %v1837_v17  ;;  %v1883_v17 = vperm.slane %v3562_v16, 0 }
 0x452   :  { %2073 = vmatmul.msk.f32.vlgmr.msrb.gmra.mxu3 %vm1299_vm6, %v1614_v4  ;;  %v1815_v31 = vsel %vm1813_vm2, 1, %v2259_v19  ;;  %v2076_v4 = vld [vmem:[%s3734_s6 + $0x18] sm:$0xff] }
 0x453   :  { %1923 = vmatpush.msrb.mxu3 %v3176_v30  ;;  %v1811_v30 = vrot.slane %v3562_v16, 1  ;;  %v1817_v59 = vperm.slane %v1815_v31, 0  ;;  %v1362_v16 = vld [vmem:[%s3734_s6 + $0x8] sm:$0xff] }
 0x455   :  { %1924 = vmatpush.msrb.mxu3 %v3070_v9  ;;  %v1779_v6 = vpop.xlane.xlu1 %1778  ;;  %v1840_v9 = vperm.slane %v1770_v41, %v3216_v10  ;;  %vm1814_vm11 = vcmp.gt.f32.partialorder %v1811_v30, 0.0  ;;  %v1398_v41 = vpop.f32.mrf.mxu3 }
 0x456   :  { %v1776_v20 = vpop.xlane.xlu0 %1775  ;;  %v1844_v21 = vperm.slane %v1779_v6, %v3219_v33  ;;  %v1816_v0 = vsel %vm1814_vm11, 1, %v2259_v19 }
 0x457   :  { %v1843_v12 = vperm.slane %v1776_v20, %v3216_v10  ;;  %v1842_v25 = vsel %vm1266_vm9, %v1841_v23, %v1840_v9  ;;  %v1818_v22 = vperm.slane %v1816_v0, 0  ;;  %v1405_v0 = vmul.f32 %v1362_v16, %v3464_v46 }
 0x458   :  { %v1861_v38 = vsel %vm1149_vm10, %v1842_v25, %v1839_v14 }
 0x459   :  { %v1845_v26 = vsel %vm1266_vm9, %v1844_v21, %v1843_v12  ;;  %vm1820_vm10 = vcmp.eq.s32.totalorder %v1818_v22, 1  ;;  %v1884_v21 = vperm.slane %v1811_v30, 0 }
 0x45a   :  { %2074 = vmatmul.msk.f32.gmra.mxu3 %vm1299_vm6, %v1615_v50  ;;  %v1862_v39 = vsel %vm1151_vm13, %v1845_v26, %v1861_v38  ;;  %vm1819_vm13 = vcmp.eq.s32.totalorder %v1817_v59, 1  ;;  %v2075_v26 = vld [vmem:[%s3734_s6 + $0x10] sm:$0xff] }
 0x45d   :  { %v1788_v28 = vpop.xlane.xlu1 %1787  ;;  %v3608_v3 = vpop.f32.mrf.mxu3 }
 0x45e   :  { %v1785_v55 = vpop.xlane.xlu0 %1784  ;;  %v1849_v5 = vperm.slane %v1788_v28, %v3216_v10 }
 0x45f   :  { %v1847_v52 = vperm.slane %v1785_v55, %v3219_v33  ;;  %v3619_v55 = vld [vmem:[%s3733_s8] ss:$0 sm:$0xff] }
 0x460   :  { %v1851_v45 = vsel %vm1266_vm9, %v1850_v36, %v1849_v5  ;;  %v1399_v9 = vadd.f32 %v3619_v55, %v1398_v41 }
 0x461   :  { %v1848_v18 = vsel %vm1266_vm9, %v1847_v52, %v1846_v24 }
 0x462   :  { %v1863_v43 = vsel %vm1153_vm1, %v1848_v18, %v1862_v39  ;;  %vm1115_vm1 = vcmp.lt.s32.totalorder %v3216_v10, 8 }
 0x463   :  { %v1864_v27 = vsel %vm1155_vm0, %v1851_v45, %v1863_v43 }
 0x465   :  { %v1797_v44 = vpop.xlane.xlu1 %1796 }
 0x466   :  { %v1794_v11 = vpop.xlane.xlu0 %1793  ;;  %v1853_v60 = vperm.slane %v1797_v44, %v3219_v33 }
 0x467   :  { %v1852_v34 = vperm.slane %v1794_v11, %v3216_v10 }
 0x469   :  { %v1854_v15 = vsel %vm1266_vm9, %v1853_v60, %v1852_v34  ;;  %v1409_v34 = vsel %vm952_vm5, %v1405_v0, 0.0  ;;  %v2177_v60 = vld [vmem:[%s3733_s8 + $0x1] ss:$0 sm:$0xff] }
 0x46a   :  { %v1865_v61 = vsel %vm1157_vm12, %v1854_v15, %v1864_v27 }
 0x46d   :  { %v1806_v2 = vpop.xlane.xlu1 %1805 }
 0x46e   :  { %v1803_v51 = vpop.xlane.xlu0 %1802  ;;  %v1858_v19 = vperm.slane %v1806_v2, %v3216_v10 }
 0x46f   :  { %v1856_v53 = vperm.slane %v1803_v51, %v3219_v33 }
 0x470   :  { %v1860_v58 = vsel %vm1266_vm9, %v1859_v32, %v1858_v19 }
 0x471   :  { %v1857_v56 = vsel %vm1266_vm9, %v1856_v53, %v1855_v8 }
 0x472   :  { %v1866_v62 = vsel %vm1159_vm14, %v1857_v56, %v1865_v61  ;;  %v2116_v56 = vld [vmem:[%s3732_s7 + $0xb8] sm:$0xff]  ;;  %v2115_v61 = vld [vmem:[%s3732_s7 + $0xb0] sm:$0xff] }
 0x473   :  { %v1867_v40 = vsel %vm1161_vm15, %v1860_v58, %v1866_v62  ;;  %v2114_v62 = vld [vmem:[%s3732_s7 + $0xa8] sm:$0xff] }
 0x474   :  { %v1870_v29 = vsel %vm1820_vm10, %v1867_v40, -1e+30  ;;  %v1869_v63 = vsel %vm1819_vm13, %v1867_v40, -1e+30  ;;  %v2113_v40 = vld [vmem:[%s3732_s7 + $0xa0] sm:$0xff] }
 0x475   :  { %v1874_v47 = vsel %vm1299_vm6, %v1870_v29, -inf  ;;  %v1871_v33 = vsel %vm1299_vm6, %v1869_v63, -inf }
 0x476   :  { %1875 = vmax.xlane.f32.xlu1 %v1874_v47  ;;  %1872 = vmax.xlane.f32.xlu0 %v1871_v33  ;;  %v2111_v33 = vld [vmem:[%s3732_s7 + $0x90] sm:$0xff] }
 0x47e   :  { %1407 = vadd.xlane.f32.xlu1 %v1406_v35  ;;  %v2109_v35 = vld [vmem:[%s3732_s7 + $0x80] sm:$0xff] }
 0x4d5   :  { %v1639_v7 = vpop.f32.mrf.mxu3 }
 0x4d6   :  { %2086 = vmatmul.msk.f32.vlgmr.msra.gmra.mxu3 %vm952_vm5, %v1639_v7  ;;  %v1691_v5 = vmul.f32 %v2075_v26, %v1639_v7  ;;  %v2107_v7 = vld [vmem:[%s3734_s6 + $0x20] sm:$0xff] }
 0x4d7   :  { %1963 = vmatpush.msra.mxu3 %v2116_v56 }
 0x4d8   :  { %v1693_v18 = vsel %vm952_vm5, %v1691_v5, 0.0 }
 0x4d9   :  { %1964 = vmatpush.msra.mxu3 %v2115_v61 }
 0x4db   :  { %1965 = vmatpush.msra.mxu3 %v2114_v62 }
 0x4dd   :  { %v1642_v13 = vpop.f32.mrf.mxu3  ;;  %1966 = vmatpush.msra.mxu3 %v2113_v40 }
 0x4de   :  { %v1692_v6 = vmul.f32 %v2076_v4, %v1642_v13  ;;  %2087 = vmatmul.msk.f32.gmra.mxu3 %vm952_vm5, %v1642_v13 }
 0x4e0   :  { %v1696_v20 = vsel %vm952_vm5, %v1692_v6, 0.0 }
 0x4e1   :  { %1697 = vadd.xlane.f32.xlu1 %v1696_v20 }
 0x4e9   :  { %v1876_v54 = vpop.xlane.xlu1 %1875  ;;  %v1873_v42 = vpop.xlane.xlu0 %1872 }
 0x4ea   :  { %v1878_v50 = vsub.f32 %v1870_v29, %v1876_v54  ;;  %v1877_v28 = vsub.f32 %v1869_v63, %v1873_v42  ;;  %v2112_v29 = vld [vmem:[%s3732_s7 + $0x98] sm:$0xff]  ;;  %v1402_v54 = vadd.f32 %v3619_v55, %v3608_v3  ;;  %v2108_v42 = vld [vmem:[%s3734_s6 + $0x28] sm:$0xff] }
 0x4eb   :  { %1967 = vmatpush.msra.mxu3 %v2112_v29 }
 0x4ec   :  { %v1881_v48 = vmul.f32 1.442695, %v1878_v50  ;;  %v1879_v1 = vmul.f32 1.442695, %v1877_v28 }
 0x4ed   :  { %1968 = vmatpush.msra.mxu3 %v2111_v33 }
 0x4ee   :  { %2227 = vpow2.f32 %v1881_v48 }
 0x4ef   :  { %2229 = vpow2.f32 %v1879_v1  ;;  %1969 = vmatpush.msra.mxu3 %v2110_v49 }
 0x4f1   :  { %v1408_v12 = vpop.xlane.xlu1 %1407  ;;  %1970 = vmatpush.msra.mxu3 %v2109_v35 }
 0x4f2   :  { %v3625_v44 = vadd.f32 %v1408_v12, %v1399_v9 }
 0x4f4   :  { %v2228_v23 = vpop.eup %2227  ;;  %v1414_v52 = vsel %vm1115_vm1, %v3625_v44, -1e+30 }
 0x4f5   :  { %v2230_v11 = vpop.eup %2229  ;;  %1416 = vmax.xlane.f32.xlu1 %v1414_v52  ;;  %v1888_v24 = vmul.f32 %v2228_v23, %v1884_v21 }
 0x4f6   :  { %v1887_v14 = vmul.f32 %v2230_v11, %v1883_v17 }
 0x4f7   :  { %v1892_v25 = vsel %vm1299_vm6, %v1888_v24, 0.0 }
 0x4f8   :  { %1893 = vadd.xlane.f32.xlu0 %v1892_v25  ;;  %v1889_v30 = vsel %vm1299_vm6, %v1887_v14, 0.0 }
 0x4f9   :  { %1890 = vadd.xlane.f32.xlu2 %v1889_v30 }
 0x500   :  { %1694 = vadd.xlane.f32.xlu0 %v1693_v18 }
 0x501   :  { %1410 = vadd.xlane.f32.xlu2 %v1409_v34 }
 0x554   :  { %v1698_v37 = vpop.xlane.xlu1 %1697 }
 0x559   :  { %v1685_v31 = vpop.f32.mrf.mxu3 }
 0x55a   :  { %v3645_v36 = vadd.f32 %v2177_v60, %v1685_v31 }
 0x561   :  { %v1688_v38 = vpop.f32.mrf.mxu3 }
 0x562   :  { %v1689_v39 = vadd.f32 %v2177_v60, %v1688_v38 }
 0x564   :  { %v3647_v43 = vadd.f32 %v1698_v37, %v1689_v39 }
 0x566   :  { %v1702_v46 = vsel %vm1115_vm1, %v3647_v43, -1e+30 }
 0x567   :  { %1705 = vmax.xlane.f32.xlu1 %v1702_v46 }
 0x568   :  { %v3652_v45 = vpop.xlane.xlu1 %1416 }
 0x569   :  { %v1420_v2 = vsub.f32 %v1414_v52, %v3652_v45  ;;  %v2178_v52 = vld [vmem:[%s3733_s8 + $0x2] ss:$0 sm:$0xff] }
 0x56b   :  { %v1422_v22 = vmul.f32 1.442695, %v1420_v2  ;;  %v1894_v32 = vpop.xlane.xlu0 %1893 }
 0x56c   :  { %v1891_v59 = vpop.xlane.xlu2 %1890  ;;  %vm1896_vm12 = vcmp.gt.f32.partialorder %v1894_v32, 0.0 }
 0x56d   :  { %2231 = vpow2.f32 %v1422_v22  ;;  %vm1895_vm0 = vcmp.gt.f32.partialorder %v1891_v59, 0.0  ;;  %v1898_v51 = vsel %vm1896_vm12, %v1894_v32, 1.0 }
 0x56e   :  { %v1897_v15 = vsel %vm1895_vm0, %v1891_v59, 1.0 }
 0x56f   :  { %2233 = vrcp.f32 %v1897_v15 }
 0x570   :  { %2235 = vrcp.f32 %v1898_v51 }
 0x573   :  { %v2232_v19 = vpop.eup %2231  ;;  %v1695_v12 = vpop.xlane.xlu0 %1694 }
 0x574   :  { %1426 = vadd.xlane.f32.xlu1 %v2232_v19  ;;  %v1411_v20 = vpop.xlane.xlu2 %1410  ;;  %v3702_v3 = vadd.f32 %v1695_v12, %v3645_v36 }
 0x575   :  { %v2234_v8 = vpop.eup %2233  ;;  %v3694_v50 = vadd.f32 %v1411_v20, %v1402_v54 }
 0x576   :  { %v1901_v53 = vmul.f32 %v2234_v8, %v1887_v14  ;;  %v2236_v27 = vpop.eup %2235  ;;  %v1701_v55 = vsel %vm1115_vm1, %v3702_v3, -1e+30 }
 0x577   :  { %v1902_v58 = vmul.f32 %v2236_v27, %v1888_v24  ;;  %v1415_v1 = vsel %vm1115_vm1, %v3694_v50, -1e+30 }
 0x578   :  { %2105 = vmatmul.msk.f32.vlgmr.msrb.gmra.mxu3 %vm1299_vm6, %v1901_v53 }
 0x580   :  { %2106 = vmatmul.msk.f32.gmra.mxu3 %vm1299_vm6, %v1902_v58 }
 0x5da   :  { %v3672_v63 = vpop.xlane.xlu1 %1705 }
 0x5db   :  { %v1708_v47 = vsub.f32 %v1702_v46, %v3672_v63 }
 0x5dd   :  { %v1711_v57 = vmul.f32 1.442695, %v1708_v47 }
 0x5df   :  { %2237 = vpow2.f32 %v1711_v57 }
 0x5e5   :  { %v2238_v41 = vpop.eup %2237 }
 0x5e6   :  { %1715 = vadd.xlane.f32.xlu1 %v2238_v41 }
 0x5e7   :  { %v1427_v10 = vpop.xlane.xlu1 %1426 }
 0x5fb   :  { %v1926_v4 = vpop.f32.mrf.mxu3 }
 0x5fc   :  { %v1978_v13 = vmul.f32 %v2107_v7, %v1926_v4  ;;  %2118 = vmatmul.msk.f32.vlgmr.msra.gmra.mxu3 %vm952_vm5, %v1926_v4 }
 0x5fe   :  { %v1980_v6 = vsel %vm952_vm5, %v1978_v13, 0.0 }
 0x5ff   :  { %1981 = vadd.xlane.f32.xlu2 %v1980_v6 }
 0x603   :  { %v1929_v28 = vpop.f32.mrf.mxu3 }
 0x604   :  { %v1979_v48 = vmul.f32 %v2108_v42, %v1929_v28  ;;  %2119 = vmatmul.msk.f32.gmra.mxu3 %vm952_vm5, %v1929_v28 }
 0x606   :  { %v1983_v9 = vsel %vm952_vm5, %v1979_v48, 0.0 }
 0x607   :  { %1418 = vmax.xlane.f32.xlu2 %v1415_v1  ;;  %1984 = vadd.xlane.f32.xlu0 %v1983_v9 }
 0x60f   :  { %1703 = vmax.xlane.f32.xlu0 %v1701_v55 }
 0x659   :  { %v1716_v53 = vpop.xlane.xlu1 %1715 }
 0x672   :  { %v1982_v21 = vpop.xlane.xlu2 %1981 }
 0x67a   :  { %v1985_v17 = vpop.xlane.xlu0 %1984  ;;  %v1419_v23 = vpop.xlane.xlu2 %1418 }
 0x67b   :  { %v1421_v11 = vsub.f32 %v1415_v1, %v1419_v23 }
 0x67d   :  { %v1424_v25 = vmul.f32 1.442695, %v1421_v11 }
 0x67f   :  { %v1972_v24 = vpop.f32.mrf.mxu3  ;;  %2239 = vpow2.f32 %v1424_v25 }
 0x680   :  { %v1973_v14 = vadd.f32 %v2178_v52, %v1972_v24 }
 0x682   :  { %v1986_v26 = vadd.f32 %v1982_v21, %v1973_v14  ;;  %v1704_v30 = vpop.xlane.xlu0 %1703 }
 0x683   :  { %v1707_v5 = vsub.f32 %v1701_v55, %v1704_v30 }
 0x684   :  { %v1988_v16 = vsel %vm1115_vm1, %v1986_v26, -1e+30 }
 0x685   :  { %1990 = vmax.xlane.f32.xlu2 %v1988_v16  ;;  %v1709_v34 = vmul.f32 1.442695, %v1707_v5  ;;  %v2240_v31 = vpop.eup %2239 }
 0x687   :  { %v1975_v0 = vpop.f32.mrf.mxu3  ;;  %2241 = vpow2.f32 %v1709_v34 }
 0x688   :  { %v1976_v18 = vadd.f32 %v2178_v52, %v1975_v0 }
 0x68a   :  { %v1987_v60 = vadd.f32 %v1985_v17, %v1976_v18 }
 0x68c   :  { %v1989_v36 = vsel %vm1115_vm1, %v1987_v60, -1e+30 }
 0x68d   :  { %1428 = vadd.xlane.f32.xlu2 %v2240_v31  ;;  %1992 = vmax.xlane.f32.xlu0 %v1989_v36  ;;  %v2242_v37 = vpop.eup %2241 }
 0x695   :  { %1713 = vadd.xlane.f32.xlu0 %v2242_v37 }
 0x6f8   :  { %v1991_v38 = vpop.xlane.xlu2 %1990 }
 0x6f9   :  { %v1994_v39 = vsub.f32 %v1988_v16, %v1991_v38 }
 0x6fb   :  { %v1996_v46 = vmul.f32 1.442695, %v1994_v39 }
 0x6fd   :  { %2243 = vpow2.f32 %v1996_v46 }
 0x700   :  { %v1993_v2 = vpop.xlane.xlu0 %1992  ;;  %v1429_v19 = vpop.xlane.xlu2 %1428 }
 0x701   :  { %v1995_v22 = vsub.f32 %v1989_v36, %v1993_v2 }
 0x703   :  { %v2244_v59 = vpop.eup %2243  ;;  %v1998_v32 = vmul.f32 1.442695, %v1995_v22 }
 0x704   :  { %2000 = vadd.xlane.f32.xlu2 %v2244_v59 }
 0x705   :  { %2245 = vpow2.f32 %v1998_v32 }
 0x708   :  { %v1714_v51 = vpop.xlane.xlu0 %1713 }
 0x709   :  { %2247 = vlog2.f32 %v1714_v51 }
 0x70a   :  { %2249 = vlog2.f32 %v1427_v10 }
 0x70b   :  { %v2246_v15 = vpop.eup %2245  ;;  %2251 = vlog2.f32 %v1429_v19 }
 0x70c   :  { %2002 = vadd.xlane.f32.xlu0 %v2246_v15  ;;  %2253 = vlog2.f32 %v1716_v53 }
 0x70f   :  { %v2248_v8 = vpop.eup %2247 }
 0x710   :  { %v2250_v27 = vpop.eup %2249  ;;  %v1718_v58 = vmul.f32 0.6931472, %v2248_v8 }
 0x711   :  { %v1431_v61 = vmul.f32 0.6931472, %v2250_v27  ;;  %v2252_v40 = vpop.eup %2251 }
 0x712   :  { %v1721_v62 = vadd.f32 %v1718_v58, %v1704_v30  ;;  %v2254_v29 = vpop.eup %2253  ;;  %v1433_v57 = vmul.f32 0.6931472, %v2252_v40 }
 0x713   :  { %v1434_v47 = vadd.f32 %v1431_v61, %v3652_v45  ;;  %v1720_v4 = vmul.f32 0.6931472, %v2254_v29 }
 0x714   :  { %v1723_v49 = vsub.f32 %v3702_v3, %v1721_v62  ;;  %v1435_v6 = vadd.f32 %v1433_v57, %v1419_v23 }
 0x715   :  { %v1436_v7 = vsub.f32 %v3625_v44, %v1434_v47  ;;  %v1722_v42 = vadd.f32 %v1720_v4, %v3672_v63 }
 0x716   :  { %v1437_v45 = vsub.f32 %v3694_v50, %v1435_v6 }
 0x717   :  { %v1725_v20 = vadd.f32 %v1723_v49, %v1436_v7  ;;  %v1724_v9 = vsub.f32 %v3647_v43, %v1722_v42 }
 0x719   :  { %v1726_v44 = vadd.f32 %v1724_v9, %v1437_v45 }
 0x777   :  { %v2001_v56 = vpop.xlane.xlu2 %2000 }
 0x778   :  { %2255 = vlog2.f32 %v2001_v56 }
 0x77e   :  { %v2256_v33 = vpop.eup %2255 }
 0x77f   :  { %v2005_v35 = vmul.f32 0.6931472, %v2256_v33  ;;  %v2003_v41 = vpop.xlane.xlu0 %2002 }
 0x780   :  { %2257 = vlog2.f32 %v2003_v41 }
 0x781   :  { %v2008_v13 = vadd.f32 %v2005_v35, %v1991_v38 }
 0x783   :  { %v2010_v54 = vsub.f32 %v1986_v26, %v2008_v13 }
 0x785   :  { %v2012_v28 = vadd.f32 %v2010_v54, %v1725_v20 }
 0x786   :  { %v2258_v48 = vpop.eup %2257 }
 0x787   :  { %2014 = vst [vmem:[%s3735_s9] sm:$0xff] %v2012_v28  ;;  %v2007_v1 = vmul.f32 0.6931472, %v2258_v48 }
 0x789   :  { %v2009_v12 = vadd.f32 %v2007_v1, %v1993_v2 }
 0x78b   :  { %v2011_v3 = vsub.f32 %v1987_v60, %v2009_v12 }
 0x78d   :  { %v2013_v55 = vadd.f32 %v2011_v3, %v1726_v44 }
 0x78f   :  { %2015 = vst [vmem:[%s3735_s9 + $0x8] sm:$0xff] %v2013_v55 }

</bundles_post_ra>
